<compile_context>
chip_gen: v7x
topology: tpu7x:2x2x1
jax: 0.10.0
libtpu: 0.0.40
codegen_flags: <defaults>
</compile_context>

<pallas_src>
import functools

import jax
import jax.numpy as jnp
from jax.experimental import pallas as pl
from jax.experimental.pallas import tpu as pltpu


def _round_up(x: int, m: int) -> int:
    return (x + m - 1) // m * m


def _text_encoder_kernel(emb_ref, wconv_ref, bconv_ref, watt_ref, batt_ref,
                         qvec_ref, out_ref, *, window: int, l_out: int,
                         l_valid: int):
    tb = emb_ref.shape[0]
    d = emb_ref.shape[2]                       # true embedding dim (no pad)
    f_pad = wconv_ref.shape[2]
    q_pad = watt_ref.shape[1]

    # Conv2d(1, F, (W, D)) as W accumulating MXU matmuls (no im2col
    # materialization).  The sequence-edge zero halo was pre-staged in the
    # wrapper, so every shifted window is a plain static slice.
    conv = jnp.zeros((tb * l_out, f_pad), jnp.float32)
    for w in range(window):
        lhs = emb_ref[:, w:w + l_out, :].reshape(tb * l_out, d)      # bf16
        conv = conv + jnp.dot(lhs, wconv_ref[w],
                              preferred_element_type=jnp.float32)
    conv = conv + bconv_ref[...]                       # (TB*L_pad, F_pad) f32
    act = jnp.maximum(conv, 0.0)                       # ReLU (dropout = id)

    # Additive attention: proj = tanh(act @ Wa + ba); scores = proj . q
    proj = jnp.dot(act.astype(jnp.bfloat16), watt_ref[...],
                   preferred_element_type=jnp.float32)
    proj = jnp.tanh(proj + batt_ref[...])              # (TB*L_pad, Q_pad) f32
    proj = proj.reshape(tb, l_out, q_pad)
    scores = jnp.sum(proj * qvec_ref[...][None, :, :], axis=-1)   # (TB, L_pad)

    # Softmax over the sequence (lane) axis.  Padded positions l >= l_valid
    # carry relu(bias) != 0 but are excluded by the -1e30 mask: exp underflows
    # to exactly 0 in f32 (scores/softmax must stay f32 for this to hold).
    pos = jax.lax.broadcasted_iota(jnp.int32, (tb, l_out), 1)
    scores = jnp.where(pos < l_valid, scores, -1e30)
    m = jnp.max(scores, axis=-1, keepdims=True)
    p = jnp.exp(scores - m)
    s = jnp.sum(p, axis=-1, keepdims=True)
    alpha = p * pl.reciprocal(s, approx=False)         # (TB, L_pad)

    # Weighted sum of conv activations -> (TB, F_pad).  Kept on VPU/XLU
    # (an M=1 batched MXU dot would only add drain latency).
    act3 = act.reshape(tb, l_out, f_pad)
    out_ref[...] = jnp.sum(act3 * alpha[:, :, None], axis=1)


def text_encoder_forward(text, emb_table, conv_w, conv_b, att_w, att_b, q_vec,
                         *, window_size: int, batch_tile: int = 64):
    """Pallas TextEncoder forward.  text: (B, L) int32 -> (B, F) f32."""
    assert window_size % 2 == 1, "PyTorch output length == L only for odd W"
    B, L = text.shape
    D = emb_table.shape[1]
    F_ = conv_w.shape[0]
    Q = att_w.shape[0]
    pad = (window_size - 1) // 2

    f_pad = _round_up(F_, 128)
    q_pad = _round_up(Q, 128)
    l_out = _round_up(L, 8)                       # padded output seq length
    l_in = _round_up(l_out + window_size - 1, 8)  # pre-padded conv input length

    # Batch tile: as large as requested, but keep >= 2 grid steps whenever the
    # batch allows it so both v7x TensorCores get work on the "parallel" axis.
    tb = min(batch_tile, _round_up(max(B // 2, 1), 8))
    tb = max(8, _round_up(tb, 8))
    b_pad = _round_up(B, tb)

    # --- glue: bf16 embedding gather + single-pad staging (no f32 pass, no D
    # lane padding; block last dim == full array dim D satisfies (8,128)).
    emb = jnp.take(emb_table.astype(jnp.bfloat16), text, axis=0)   # (B, L, D)
    emb_staged = jnp.pad(emb,
                         ((0, b_pad - B), (pad, l_in - L - pad), (0, 0)))
    # TODO(synk): fold the gather into the kernel (scalar-prefetched token ids
    # + per-row DMAs) to drop this extra HBM pass over (B, L, D).

    # Conv weight (F, 1, W, D) -> (W, D, F_pad), bf16.
    wc = jnp.transpose(conv_w[:, 0, :, :], (1, 2, 0))              # (W, D, F)
    wc = jnp.pad(wc, ((0, 0), (0, 0), (0, f_pad - F_))).astype(jnp.bfloat16)
    bc = jnp.pad(conv_b, (0, f_pad - F_)).reshape(1, f_pad).astype(jnp.float32)

    # Attention linear (Q, F) -> (F_pad, Q_pad); bias / query padded to Q_pad.
    wa = jnp.pad(att_w.T, ((0, f_pad - F_), (0, q_pad - Q))).astype(jnp.bfloat16)
    ba = jnp.pad(att_b, (0, q_pad - Q)).reshape(1, q_pad).astype(jnp.float32)
    qv = jnp.pad(q_vec, (0, q_pad - Q)).reshape(1, q_pad).astype(jnp.float32)

    kernel = functools.partial(_text_encoder_kernel, window=window_size,
                               l_out=l_out, l_valid=L)
    grid = (b_pad // tb,)

    flops = 2 * B * L * (window_size * D * F_ + F_ * Q + Q + F_)
    bytes_accessed = (emb_staged.size * 2 + wc.size * 2 + wa.size * 2
                      + (bc.size + ba.size + qv.size) * 4 + b_pad * f_pad * 4)
    cost = pl.CostEstimate(flops=flops,
                           transcendentals=B * L * (Q + 1),
                           bytes_accessed=bytes_accessed)

    out = pl.pallas_call(
        kernel,
        out_shape=jax.ShapeDtypeStruct((b_pad, f_pad), jnp.float32),
        grid_spec=pltpu.PrefetchScalarGridSpec(
            num_scalar_prefetch=0,
            grid=grid,
            in_specs=[
                # batch-tiled activation stream, last dim = D (unpadded)
                pl.BlockSpec((tb, l_in, D), lambda i: (i, 0, 0)),
                # VMEM-resident weights (constant index maps -> DMA'd once)
                pl.BlockSpec((window_size, D, f_pad), lambda i: (0, 0, 0)),
                pl.BlockSpec((1, f_pad), lambda i: (0, 0)),
                pl.BlockSpec((f_pad, q_pad), lambda i: (0, 0)),
                pl.BlockSpec((1, q_pad), lambda i: (0, 0)),
                pl.BlockSpec((1, q_pad), lambda i: (0, 0)),
            ],
            out_specs=pl.BlockSpec((tb, f_pad), lambda i: (i, 0)),
        ),
        compiler_params=pltpu.CompilerParams(
            dimension_semantics=("parallel",)),
        cost_estimate=cost,
    )(emb_staged, wc, bc, wa, ba, qv)

    return out[:B, :F_]


def text_encoder_reference(text, emb_table, conv_w, conv_b, att_w, att_b,
                           q_vec, window_size):
    """Pure-JAX f32 reference matching the PyTorch module in eval mode."""
    pad = (window_size - 1) // 2
    emb = jnp.take(emb_table, text, axis=0)                       # (B, L, D)
    B, L, _ = emb.shape
    emb_p = jnp.pad(emb, ((0, 0), (pad, pad), (0, 0)))
    conv = conv_b[None, None, :]
    for w in range(window_size):
        conv = conv + jnp.einsum('bld,fd->blf', emb_p[:, w:w + L, :],
                                 conv_w[:, 0, w, :])
    act = jnp.maximum(conv, 0.0)                                  # (B, L, F)
    proj = jnp.tanh(jnp.einsum('blf,qf->blq', act, att_w) + att_b)
    scores = jnp.einsum('blq,q->bl', proj, q_vec)
    alpha = jax.nn.softmax(scores, axis=1)
    return jnp.einsum('bl,blf->bf', alpha, act)


if __name__ == "__main__":
    key = jax.random.PRNGKey(0)
    ks = jax.random.split(key, 7)

    # Small NAML-like shapes.
    B, L, VOCAB = 16, 20, 200
    D, F_, W, Q = 48, 96, 3, 32

    text = jax.random.randint(ks[0], (B, L), 0, VOCAB, dtype=jnp.int32)
    emb_table = jax.random.normal(ks[1], (VOCAB, D), jnp.float32) * 0.3
    conv_w = jax.random.normal(ks[2], (F_, 1, W, D), jnp.float32) * 0.1
    conv_b = jax.random.normal(ks[3], (F_,), jnp.float32) * 0.1
    att_w = jax.random.normal(ks[4], (Q, F_), jnp.float32) * 0.1
    att_b = jax.random.normal(ks[5], (Q,), jnp.float32) * 0.1
    q_vec = jax.random.uniform(ks[6], (Q,), jnp.float32, -0.1, 0.1)

    fwd = jax.jit(text_encoder_forward,
                  static_argnames=("window_size", "batch_tile"))
    out = fwd(text, emb_table, conv_w, conv_b, att_w, att_b, q_vec,
              window_size=W, batch_tile=64)
    out = jax.block_until_ready(out)

    ref = text_encoder_reference(text, emb_table, conv_w, conv_b, att_w, att_b,
                                 q_vec, W)
    assert out.shape == (B, F_), out.shape
    err = float(jnp.max(jnp.abs(out - ref)))
    assert err < 5e-2, f"max abs err vs f32 reference: {err}"
    print("KERNEL_OK")
</pallas_src>

<mosaic_0001>
module attributes {stable_mosaic.version = 11 : i64} {
  func.func @_text_encoder_kernel(%arg0: i32, %arg1: memref<8x32x48xbf16, #tpu.memory_space<vmem>>, %arg2: memref<3x48x128xbf16, #tpu.memory_space<vmem>>, %arg3: memref<1x128xf32, #tpu.memory_space<vmem>>, %arg4: memref<128x128xbf16, #tpu.memory_space<vmem>>, %arg5: memref<1x128xf32, #tpu.memory_space<vmem>>, %arg6: memref<1x128xf32, #tpu.memory_space<vmem>>, %arg7: memref<8x128xf32, #tpu.memory_space<vmem>>) attributes {dimension_semantics = [#tpu.dimension_semantics<parallel>], iteration_bounds = array<i64: 2>, scalar_prefetch = 0 : i64, scratch_operands = 0 : i64, tpu.core_type = #tpu.core_type<tc>, window_params = [{transform_indices = @transform_0, window_bounds = array<i64: 8, 32, 48>}, {pipeline_mode = #tpu.pipeline_mode<synchronous>, transform_indices = @transform_1, window_bounds = array<i64: 3, 48, 128>}, {pipeline_mode = #tpu.pipeline_mode<synchronous>, transform_indices = @transform_2, window_bounds = array<i64: 1, 128>}, {pipeline_mode = #tpu.pipeline_mode<synchronous>, transform_indices = @transform_3, window_bounds = array<i64: 128, 128>}, {pipeline_mode = #tpu.pipeline_mode<synchronous>, transform_indices = @transform_4, window_bounds = array<i64: 1, 128>}, {pipeline_mode = #tpu.pipeline_mode<synchronous>, transform_indices = @transform_5, window_bounds = array<i64: 1, 128>}, {transform_indices = @transform_6, window_bounds = array<i64: 8, 128>}]} {
    %cst = arith.constant 0.000000e+00 : f32
    %0 = vector.broadcast %cst : f32 to vector<192x128xf32>
    %c0 = arith.constant 0 : index
    %c0_0 = arith.constant 0 : index
    %c0_1 = arith.constant 0 : index
    %1 = vector.load %arg1[%c0, %c0_0, %c0_1] : memref<8x32x48xbf16, #tpu.memory_space<vmem>>, vector<8x24x48xbf16>
    %2 = vector.shape_cast %1 : vector<8x24x48xbf16> to vector<192x48xbf16>
    %c0_2 = arith.constant 0 : index
    %c0_3 = arith.constant 0 : index
    %c0_4 = arith.constant 0 : index
    %3 = vector.load %arg2[%c0_2, %c0_3, %c0_4] : memref<3x48x128xbf16, #tpu.memory_space<vmem>>, vector<1x48x128xbf16>
    %4 = vector.shape_cast %3 : vector<1x48x128xbf16> to vector<48x128xbf16>
    %cst_5 = arith.constant dense<0.000000e+00> : vector<192x128xf32>
    %5 = tpu.matmul %2, %4, %cst_5 {dimension_numbers = #tpu.dot_dimension_numbers<[1], [0], [0], [1], [0, 0, 1, 1], [], []>} : vector<192x48xbf16>, vector<48x128xbf16>, vector<192x128xf32> -> vector<192x128xf32>
    %6 = arith.addf %0, %5 : vector<192x128xf32>
    %c0_6 = arith.constant 0 : index
    %c1 = arith.constant 1 : index
    %c0_7 = arith.constant 0 : index
    %7 = vector.load %arg1[%c0_6, %c1, %c0_7] : memref<8x32x48xbf16, #tpu.memory_space<vmem>>, vector<8x24x48xbf16>
    %8 = vector.shape_cast %7 : vector<8x24x48xbf16> to vector<192x48xbf16>
    %c1_8 = arith.constant 1 : index
    %c0_9 = arith.constant 0 : index
    %c0_10 = arith.constant 0 : index
    %9 = vector.load %arg2[%c1_8, %c0_9, %c0_10] : memref<3x48x128xbf16, #tpu.memory_space<vmem>>, vector<1x48x128xbf16>
    %10 = vector.shape_cast %9 : vector<1x48x128xbf16> to vector<48x128xbf16>
    %cst_11 = arith.constant dense<0.000000e+00> : vector<192x128xf32>
    %11 = tpu.matmul %8, %10, %cst_11 {dimension_numbers = #tpu.dot_dimension_numbers<[1], [0], [0], [1], [0, 0, 1, 1], [], []>} : vector<192x48xbf16>, vector<48x128xbf16>, vector<192x128xf32> -> vector<192x128xf32>
    %12 = arith.addf %6, %11 : vector<192x128xf32>
    %c0_12 = arith.constant 0 : index
    %c2 = arith.constant 2 : index
    %c0_13 = arith.constant 0 : index
    %13 = vector.load %arg1[%c0_12, %c2, %c0_13] : memref<8x32x48xbf16, #tpu.memory_space<vmem>>, vector<8x24x48xbf16>
    %14 = vector.shape_cast %13 : vector<8x24x48xbf16> to vector<192x48xbf16>
    %c2_14 = arith.constant 2 : index
    %c0_15 = arith.constant 0 : index
    %c0_16 = arith.constant 0 : index
    %15 = vector.load %arg2[%c2_14, %c0_15, %c0_16] : memref<3x48x128xbf16, #tpu.memory_space<vmem>>, vector<1x48x128xbf16>
    %16 = vector.shape_cast %15 : vector<1x48x128xbf16> to vector<48x128xbf16>
    %cst_17 = arith.constant dense<0.000000e+00> : vector<192x128xf32>
    %17 = tpu.matmul %14, %16, %cst_17 {dimension_numbers = #tpu.dot_dimension_numbers<[1], [0], [0], [1], [0, 0, 1, 1], [], []>} : vector<192x48xbf16>, vector<48x128xbf16>, vector<192x128xf32> -> vector<192x128xf32>
    %18 = arith.addf %12, %17 : vector<192x128xf32>
    %c0_18 = arith.constant 0 : index
    %c0_19 = arith.constant 0 : index
    %19 = vector.load %arg3[%c0_18, %c0_19] : memref<1x128xf32, #tpu.memory_space<vmem>>, vector<1x128xf32>
    %20 = vector.broadcast %19 : vector<1x128xf32> to vector<192x128xf32>
    %21 = arith.addf %18, %20 : vector<192x128xf32>
    %cst_20 = arith.constant 0.000000e+00 : f32
    %22 = vector.broadcast %cst_20 : f32 to vector<192x128xf32>
    %23 = arith.maximumf %21, %22 : vector<192x128xf32>
    %24 = arith.truncf %23 : vector<192x128xf32> to vector<192x128xbf16>
    %c0_21 = arith.constant 0 : index
    %c0_22 = arith.constant 0 : index
    %25 = vector.load %arg4[%c0_21, %c0_22] : memref<128x128xbf16, #tpu.memory_space<vmem>>, vector<128x128xbf16>
    %cst_23 = arith.constant dense<0.000000e+00> : vector<192x128xf32>
    %26 = tpu.matmul %24, %25, %cst_23 {dimension_numbers = #tpu.dot_dimension_numbers<[1], [0], [0], [1], [0, 0, 1, 1], [], []>} : vector<192x128xbf16>, vector<128x128xbf16>, vector<192x128xf32> -> vector<192x128xf32>
    %c0_24 = arith.constant 0 : index
    %c0_25 = arith.constant 0 : index
    %27 = vector.load %arg5[%c0_24, %c0_25] : memref<1x128xf32, #tpu.memory_space<vmem>>, vector<1x128xf32>
    %28 = vector.broadcast %27 : vector<1x128xf32> to vector<192x128xf32>
    %29 = arith.addf %26, %28 : vector<192x128xf32>
    %30 = math.tanh %29 : vector<192x128xf32>
    %31 = vector.shape_cast %30 : vector<192x128xf32> to vector<8x24x128xf32>
    %c0_26 = arith.constant 0 : index
    %c0_27 = arith.constant 0 : index
    %32 = vector.load %arg6[%c0_26, %c0_27] : memref<1x128xf32, #tpu.memory_space<vmem>>, vector<1x128xf32>
    %33 = vector.shape_cast %32 : vector<1x128xf32> to vector<1x1x128xf32>
    %34 = vector.broadcast %33 : vector<1x1x128xf32> to vector<8x24x128xf32>
    %35 = arith.mulf %31, %34 : vector<8x24x128xf32>
    %cst_28 = arith.constant dense<0.000000e+00> : vector<8x24xf32>
    %36 = vector.multi_reduction <add>, %35, %cst_28 [2] : vector<8x24x128xf32> to vector<8x24xf32>
    %37 = tpu.iota {dimensions = array<i32: 1>} : vector<8x24xi32>
    %c20_i32 = arith.constant 20 : i32
    %38 = vector.broadcast %c20_i32 : i32 to vector<8x24xi32>
    %39 = arith.cmpi slt, %37, %38 : vector<8x24xi32>
    %cst_29 = arith.constant -1.000000e+30 : f32
    %40 = vector.broadcast %cst_29 : f32 to vector<8x24xf32>
    %41 = arith.select %39, %36, %40 : vector<8x24xi1>, vector<8x24xf32>
    %cst_30 = arith.constant dense<0xFF800000> : vector<8xf32>
    %42 = vector.multi_reduction <maximumf>, %41, %cst_30 [1] : vector<8x24xf32> to vector<8xf32>
    %43 = vector.shape_cast %42 : vector<8xf32> to vector<8x1xf32>
    %44 = vector.broadcast %43 : vector<8x1xf32> to vector<8x24xf32>
    %45 = arith.subf %41, %44 : vector<8x24xf32>
    %46 = math.exp %45 : vector<8x24xf32>
    %cst_31 = arith.constant dense<0.000000e+00> : vector<8xf32>
    %47 = vector.multi_reduction <add>, %46, %cst_31 [1] : vector<8x24xf32> to vector<8xf32>
    %48 = vector.shape_cast %47 : vector<8xf32> to vector<8x1xf32>
    %49 = tpu.reciprocal %48 : vector<8x1xf32> -> vector<8x1xf32>
    %50 = vector.broadcast %49 : vector<8x1xf32> to vector<8x24xf32>
    %51 = arith.mulf %46, %50 : vector<8x24xf32>
    %52 = vector.shape_cast %23 : vector<192x128xf32> to vector<8x24x128xf32>
    %53 = vector.shape_cast %51 : vector<8x24xf32> to vector<8x24x1xf32>
    %54 = vector.broadcast %53 : vector<8x24x1xf32> to vector<8x24x128xf32>
    %55 = arith.mulf %52, %54 : vector<8x24x128xf32>
    %cst_32 = arith.constant dense<0.000000e+00> : vector<8x128xf32>
    %56 = vector.multi_reduction <add>, %55, %cst_32 [1] : vector<8x24x128xf32> to vector<8x128xf32>
    %c0_33 = arith.constant 0 : index
    %c0_34 = arith.constant 0 : index
    %57 = vector.load %arg7[%c0_33, %c0_34] : memref<8x128xf32, #tpu.memory_space<vmem>>, vector<8x128xf32>
    tpu.vector_store %arg7[%c0_33, %c0_34], %56 {strides = array<i32>} : memref<8x128xf32, #tpu.memory_space<vmem>>, vector<8x128xf32>,
    return
  }
  func.func @transform_0(%arg0: i32) -> (i32, i32, i32) {
    %c0_i32 = arith.constant 0 : i32
    %c0_i32_0 = arith.constant 0 : i32
    %c0_i32_1 = arith.constant 0 : i32
    return %arg0, %c0_i32, %c0_i32_0 : i32, i32, i32
  }
  func.func @transform_1(%arg0: i32) -> (i32, i32, i32) {
    %c0_i32 = arith.constant 0 : i32
    %c0_i32_0 = arith.constant 0 : i32
    %c0_i32_1 = arith.constant 0 : i32
    %c0_i32_2 = arith.constant 0 : i32
    return %c0_i32, %c0_i32_0, %c0_i32_1 : i32, i32, i32
  }
  func.func @transform_2(%arg0: i32) -> (i32, i32) {
    %c0_i32 = arith.constant 0 : i32
    %c0_i32_0 = arith.constant 0 : i32
    %c0_i32_1 = arith.constant 0 : i32
    return %c0_i32, %c0_i32_0 : i32, i32
  }
  func.func @transform_3(%arg0: i32) -> (i32, i32) {
    %c0_i32 = arith.constant 0 : i32
    %c0_i32_0 = arith.constant 0 : i32
    %c0_i32_1 = arith.constant 0 : i32
    return %c0_i32, %c0_i32_0 : i32, i32
  }
  func.func @transform_4(%arg0: i32) -> (i32, i32) {
    %c0_i32 = arith.constant 0 : i32
    %c0_i32_0 = arith.constant 0 : i32
    %c0_i32_1 = arith.constant 0 : i32
    return %c0_i32, %c0_i32_0 : i32, i32
  }
  func.func @transform_5(%arg0: i32) -> (i32, i32) {
    %c0_i32 = arith.constant 0 : i32
    %c0_i32_0 = arith.constant 0 : i32
    %c0_i32_1 = arith.constant 0 : i32
    return %c0_i32, %c0_i32_0 : i32, i32
  }
  func.func @transform_6(%arg0: i32) -> (i32, i32) {
    %c0_i32 = arith.constant 0 : i32
    %c0_i32_0 = arith.constant 0 : i32
    return %arg0, %c0_i32 : i32, i32
  }
}

</mosaic_0001>

<bundles_post_ra>
// kernel: text_encoder_forward.1
= control target key start
LH: loop header
LB: loop body
LE: loop exit
PB: predicated region body
PF: predicated region fallthrough
CT: control target
= control target key end

     0   :  { %11 = vsyncpa [#allocation3], 0  ;;  %s3780_s0 = inlined_call_operand.vmem [shape: bf16[16,32,48], index: 0, kind: input, shape index: {}]   ;;  %s3781_s1 = inlined_call_operand.vmem [shape: bf16[3,48,128], index: 1, kind: input, shape index: {}]   ;;  %s3782_s2 = inlined_call_operand.vmem [shape: f32[1,128], index: 2, kind: input, shape index: {}]   ;;  %s3783_s3 = inlined_call_operand.vmem [shape: bf16[128,128], index: 3, kind: input, shape index: {}]   ;;  %s3784_s4 = inlined_call_operand.vmem [shape: f32[1,128], index: 4, kind: input, shape index: {}]   ;;  %s3785_s5 = inlined_call_operand.vmem [shape: f32[1,128], index: 5, kind: input, shape index: {}]   ;;  %s3786_s6 = inlined_call_operand.hbm [shape: f32[16,128], index: 6, kind: output, shape index: {}]  }
   0x1   :  { %13 = vsyncpa [#allocation3 + $0x1], 0  ;;  %s2823_s21 = smov 0   ;;  %s2825_s22 = smov 0  }
   0x2   :  { %s2827_s23 = smov 0   ;;  %s2829_s24 = smov 0  }
   0x3 LB: > { %s2844_s25 = sadd.s32 4294967295, %s2785_s24   ;;  %s2235_s26 = sadd.s32 4294967294, %s2785_s24   ;;  %s2785_s24 = sphi %s2829_s24, %s3840_s24   ;;  %s2781_s23 = sphi %s2827_s23, %s3839_s23   ;;  %s2777_s22 = sphi %s2825_s22, %s3838_s22   ;;  %s2773_s21 = sphi %s2823_s21, %s3837_s21  }
   0x4   : > { %s2848_s27 = sadd.s32 1, %s2785_s24   ;;  %s157_s28 = sadd.s32 1, %s2781_s23 }
   0x5   : > { %s154_s29 = ssub.s32 %s2785_s24, %s2848_s27  ;;  %p167_p0 = scmp.ne.s32.totalorder %s2781_s23, %s2777_s22 }
   0x6   : > { %p155_p1 = scmp.eq.s32.totalorder %s154_s29, 0  ;;  %p168_p2 = scmp.eq.s32.totalorder %s2844_s25, 1 }
   0x7   : > { %p173_p3 = scmp.ne.s32.totalorder %s2777_s22, %s2773_s21  ;;  %p174_p4 = scmp.eq.s32.totalorder %s2235_s26, 1 }
   0x8   : > { %s2859_s30 = scalar_select %p155_p1, %s2781_s23, %s157_s28  }
   0x9   : > { %p2861_p5 = por %p168_p2, %p167_p0  ;;  %p2865_p6 = por %p174_p4, %p173_p3 }
   0xa   : > { %p2238_p7 = scmp.ge.s32.totalorder %s2785_s24, 1  ;;  %p217_p8 = scmp.lt.s32.totalorder %s2785_s24, 3 }
   0xc   : > { %p218_p9 = pnand %p2238_p7, %p217_p8 }
   0xd   : > { %v2642_v0 = vld [vmem:[%s3781_s1] sm:$0xff] (!%p218_p9)   ;;  %s2240_s11 = sshll.u32 (!%p218_p9), %s2844_s25, 3  ;;  %v2643_v1 = vld [vmem:[%s3781_s1 + $0x8] sm:$0xff] (!%p218_p9)   ;;  %v2644_v2 = vld [vmem:[%s3781_s1 + $0x10] sm:$0xff] (!%p218_p9)   ;;  %vm630_vm0 = vcmask (!%p218_p9), 392192   ;;  %vm1063_vm4 = vcmask (!%p218_p9), 1042432  }
   0xe   : > { %221 = sbr.rel (%p218_p9) target bundleno = 1233 (0x4d1), region = 44  ;;  %p249_p10 = scmp.lt.s32.totalorder (!%p218_p9), %s2240_s11, 15  ;;  %2455 = vmatprep.subr.bf16.mxu0 (!%p218_p9), %v2642_v0  ;;  %v2658_v3 = vld [vmem:[%s3781_s1 + $0x18] sm:$0xff] (!%p218_p9)   ;;  %v2647_v9 = vld [vmem:[%s3781_s1 + $0x30] sm:$0xff] (!%p218_p9)   ;;  %v2659_v10 = vld [vmem:[%s3781_s1 + $0x20] sm:$0xff] (!%p218_p9)   ;;  %vm1064_vm5 = vcmask (!%p218_p9), 1046532  }
   0xf   : > { %2456 = vmatpush3.bf16.msra.mxu0 (!%p218_p9), %v2642_v0  ;;  %2425 = vmatprep.subr.bf16.mxu1 (!%p218_p9), %v2658_v3  ;;  %v2662_v16 = vld [vmem:[%s3781_s1 + $0x28] sm:$0xff] (!%p218_p9)   ;;  %v2652_v21 = vld [vmem:[%s3781_s1 + $0x38] sm:$0xff] (!%p218_p9)   ;;  %v2657_v28 = vld [vmem:[%s3781_s1 + $0x40] sm:$0xff] (!%p218_p9)   ;;  %vm294_vm1 = vsmask.f32 (!%p218_p9), 3328  ;;  %vm1802_vm7 = vcmask (!%p218_p9), 130112  }
  0x10   : > { %2457 = vmatprep.subr.bf16.mxu0 (!%p218_p9), %v2643_v1  ;;  %2426 = vmatpush3.bf16.msra.mxu1 (!%p218_p9), %v2658_v3  ;;  %vm295_vm2 = vsmask.f32 (!%p218_p9), 7440  ;;  %vm3110_vm6 = vmor (!%p218_p9), %vm1063_vm4, %vm1064_vm5  ;;  %vm1809_vm8 = vcmask (!%p218_p9), 195712   ;;  %vm1909_vm9 = vcmask (!%p218_p9), 1041409   ;;  %vm1911_vm10 = vcmask (!%p218_p9), 1042434   ;;  %s245_s10 = sand.u32 (!%p218_p9), 1, %s2777_s22  }
  0x11   : > { %2427 = vmatprep.subr.bf16.mxu1 (!%p218_p9), %v2659_v10  ;;  %vm3021_vm3 = vmor (!%p218_p9), %vm294_vm1, %vm295_vm2  ;;  %vm1913_vm11 = vcmask (!%p218_p9), 1043459   ;;  %vm1915_vm12 = vcmask (!%p218_p9), 1044484   ;;  %vm1917_vm13 = vcmask (!%p218_p9), 1045509   ;;  %vm1919_vm14 = vcmask (!%p218_p9), 1046534   ;;  %s2356_s12 = sshll.u32 (!%p218_p9), %s2844_s25, 7  ;;  %s2163_s17 = scalar_lea.sflag (!%p218_p9), [#allocation3], %s245_s10 }
  0x12   : > { %vm1921_vm15 = vcmask (!%p218_p9), 1047559   ;;  %vm1925_vm1 = vcmask (!%p218_p9), 195584   ;;  %s2787_s18 = smov (!%p218_p9), [#allocation2]  }
  0x13   : > { %2458 = vmatpush3.bf16.msra.mxu0 (!%p218_p9), %v2643_v1  ;;  %s2727_s20 = sshll.u32 (!%p218_p9), %s2787_s18, 4  ;;  %s2728_s20 = int_to_ptr.vmem [resolvable:$false] %s2727_s20 }
  0x14   : > { %2459 = vmatprep.subr.bf16.mxu0 (!%p218_p9), %v2644_v2  ;;  %2428 = vmatpush3.bf16.msra.mxu1 (!%p218_p9), %v2659_v10  ;;  %s2729_s26 = scalar_lea.vmem (!%p218_p9), %s2728_s20, 256 }
  0x15   : > { %s3842_s11 = smov (!%p249_p10, %s2240_s11), 15  ;;  %2429 = vmatprep.subr.bf16.mxu1 %v2662_v16 }
  0x16   : > { %s2359_s16 = sshll.u32 %s3842_s11, 4  ;;  %s2239_s11 = sshll.u32 %s245_s10, 3 }
  0x17   : > { %s2884_s19 = scalar_lea.vmem %s3780_s0, %s2359_s16  ;;  %2460 = vmatpush3.bf16.msra.mxu0 %v2644_v2  ;;  %s247_s13 = scalar_lea.vmem [#allocation2], %s2239_s11 }
  0x18   : > { %v256_v4 = vld [vmem:[%s2884_s19] sm:$0xf]  ;;  %v2891_v5 = vld [vmem:[%s2884_s19 + $0x4] sm:$0xf]  ;;  %v2894_v6 = vld [vmem:[%s2884_s19 + $0x8] sm:$0xf]  ;;  %2485 = vmatprep.subr.bf16.mxu0 %v2647_v9  ;;  %2430 = vmatpush3.bf16.msra.mxu1 %v2662_v16  ;;  %s3737_s16 = scalar_lea.hbm %s3786_s6, %s2356_s12 }
  0x19   : > { %v2276_v7 = vcombine.low %v256_v4, %v2891_v5  ;;  %v259_v8 = vld [vmem:[%s2884_s19 + $0x10] sm:$0xf]  ;;  %v2905_v11 = vld [vmem:[%s2884_s19 + $0x14] sm:$0xf]  ;;  %v298_v12 = vshrl.u32 %v256_v4, 16  ;;  %v301_v13 = vshll.u32 %v256_v4, 16 }
  0x1a   : > { %v2277_v14 = vcombine.low %v2894_v6, %v259_v8  ;;  %v2910_v15 = vld [vmem:[%s2884_s19 + $0x18] sm:$0xf]  ;;  %v1068_v17 = vrot.slane %v2891_v5, 5  ;;  %v332_v18 = vshrl.u32 %v259_v8, 16  ;;  %v335_v19 = vshll.u32 %v259_v8, 16  ;;  %s2176_s14 = sshll.u32 %s247_s13, 4  ;;  %s3739_s14 = int_to_ptr.vmem [resolvable:$true] %s2176_s14 }
  0x1b   : > { %2461 = vmatprep.mubr.msk.bf16.mxu0 %vm630_vm0, %v2276_v7  ;;  %v2278_v20 = vcombine.low %v2905_v11, %v2910_v15  ;;  %v262_v22 = vld [vmem:[%s2884_s19 + $0x20] sm:$0xf]  ;;  %v2922_v23 = vrot.slane %v298_v12, 4  ;;  %v2924_v24 = vrot.slane %v301_v13, 5  ;;  %v311_v25 = vshrl.u32 %v2891_v5, 16  ;;  %s2723_s25 = scalar_lea.vmem %s3739_s14, 128  ;;  %p2730_p0 = scmp.lt.s32.totalorder %s3739_s14, %s2728_s20 }
  0x1c   : > { %2462 = vmatmul.mubr.msk.bf16.vlgmr.msra.gmra.mrb[0].mxu0 %vm630_vm0, %v2277_v14  ;;  %v2929_v26 = vld [vmem:[%s2884_s19 + $0x24] sm:$0xf]  ;;  %v366_v27 = vshrl.u32 %v262_v22, 16  ;;  %v2936_v29 = vrot.slane %v1068_v17, 4  ;;  %v345_v30 = vshrl.u32 %v2905_v11, 16  ;;  %v1078_v31 = vrot.slane %v2905_v11, 5  ;;  %p2724_p11 = scmp.ne.s32.totalorder %s3739_s14, %s2723_s25  ;;  %p2731_p1 = scmp.lt.s32.totalorder %s2729_s26, %s2723_s25 }
  0x1d   : > { %2486 = vmatpush3.bf16.msra.mxu0 %v2647_v9  ;;  %2465 = vmatprep.mubr.msk.bf16.mxu0 %vm630_vm0, %v2278_v20  ;;  %v369_v32 = vshll.u32 %v262_v22, 16  ;;  %v265_v33 = vld [vmem:[%s2884_s19 + $0x30] sm:$0xf]  ;;  %v2942_v34 = vrot.slane %v332_v18, 4  ;;  %v2944_v35 = vrot.slane %v335_v19, 5  ;;  %v355_v36 = vshrl.u32 %v2910_v15, 16 }
  0x1e   : > { %v2948_v37 = vld [vmem:[%s2884_s19 + $0x28] sm:$0xf]  ;;  %v400_v38 = vshrl.u32 %v265_v33, 16  ;;  %2487 = vmatprep.subr.bf16.mxu0 %v2652_v21  ;;  %v379_v39 = vshrl.u32 %v2929_v26, 16  ;;  %v2279_v40 = vcombine.low %v262_v22, %v2929_v26  ;;  %v403_v41 = vshll.u32 %v265_v33, 16  ;;  %p2725_p12 = pnand %p2724_p11, %p2861_p5  ;;  %p2732_p2 = por %p2731_p1, %p2730_p0 }
  0x1f   : > { %v2953_v42 = vld [vmem:[%s2884_s19 + $0x34] sm:$0xf]  ;;  %v2956_v43 = vld [vmem:[%s2884_s19 + $0x40] sm:$0xf]  ;;  %v2958_v44 = vrot.slane %v366_v27, 4  ;;  %v389_v45 = vshrl.u32 %v2948_v37, 16  ;;  %v2280_v50 = vcombine.low %v2948_v37, %v265_v33  ;;  %v304_v60 = vor.u32 %v2924_v24, %v2922_v23 }
  0x20   : > { %v2962_v46 = vld [vmem:[%s2884_s19 + $0x38] sm:$0xf]  ;;  %v434_v47 = vshrl.u32 %v2956_v43, 16  ;;  %v437_v48 = vshll.u32 %v2956_v43, 16  ;;  %v2966_v49 = vrot.slane %v369_v32, 5  ;;  %v413_v51 = vshrl.u32 %v2953_v42, 16  ;;  %p2726_p13 = pneg %p2725_p12 }
  0x21   : > { %v423_v52 = vshrl.u32 %v2962_v46, 16  ;;  %2488 = vmatpush3.bf16.msra.mxu0 %v2652_v21  ;;  %v2972_v53 = vld [vmem:[%s2884_s19 + $0x50] sm:$0xf]  ;;  %v2974_v54 = vrot.slane %v400_v38, 4  ;;  %v2977_v55 = vld [vmem:[%s2884_s19 + $0x44] sm:$0xf]  ;;  %v338_v61 = vor.u32 %v2944_v35, %v2942_v34  ;;  %v2281_v3 = vcombine.low %v2953_v42, %v2962_v46 }
  0x22   : > { %v468_v56 = vshrl.u32 %v2972_v53, 16  ;;  %2489 = vmatprep.subr.bf16.mxu0 %v2657_v28  ;;  %v2980_v57 = vrot.slane %v403_v41, 5  ;;  %v447_v58 = vshrl.u32 %v2977_v55, 16  ;;  %v2984_v59 = vld [vmem:[%s2884_s19 + $0x48] sm:$0xf]  ;;  %v2991_v62 = vrot.slane %v434_v47, 4  ;;  %p2733_p3 = pnand %p2732_p2, %p2726_p13 }
  0x23   : > { %v2993_v63 = vrot.slane %v437_v48, 5  ;;  %v457_v0 = vshrl.u32 %v2984_v59, 16  ;;  %v2997_v1 = vld [vmem:[%s2884_s19 + $0x54] sm:$0xf]  ;;  %v307_v2 = vshll.u32 %v2891_v5, 16  ;;  %v2282_v4 = vcombine.low %v2956_v43, %v2977_v55  ;;  %v2664_v14 = vld [vmem:[%s3783_s3 + $0x8] sm:$0xff]  }
  0x24   : > { %2466 = vmatmul.mubr.msk.bf16.gmra.mrb[4].mxu0 %vm630_vm0, %v2279_v40  ;;  %v471_v7 = vshll.u32 %v2972_v53, 16  ;;  %v3007_v8 = vld [vmem:[%s2884_s19 + $0x58] sm:$0xf]  ;;  %v3011_v10 = vld [vmem:[%s2884_s19 + $0x60] sm:$0xf]  ;;  %v3013_v12 = vrot.slane %v468_v56, 4  ;;  %v2283_v13 = vcombine.low %v2984_v59, %v2972_v53  ;;  %v372_v16 = vor.u32 %v2966_v49, %v2958_v44 }
  0x25   : > { %2469 = vmatprep.mubr.msk.bf16.mxu0 %vm630_vm0, %v2280_v50  ;;  %2490 = vmatpush3.bf16.msra.mxu0 %v2657_v28  ;;  %v502_v18 = vshrl.u32 %v3011_v10, 16  ;;  %v305_v19 = vrot.slane %v304_v60, 4  ;;  %v309_v21 = vrot.slane %v307_v2, 5  ;;  %v313_v22 = vrot.slane %v311_v25, 4  ;;  %v3030_v27 = vld [vmem:[%s2884_s19 + $0xc] sm:$0x1] }
  0x26   : > { %v317_v23 = vshll.u32 %v2894_v6, 16  ;;  %v321_v24 = vshrl.u32 %v2894_v6, 16  ;;  %v3032_v28 = vrot.slane %v471_v7, 5  ;;  %v505_v32 = vshll.u32 %v3011_v10, 16  ;;  %v3038_v35 = vld [vmem:[%s2884_s19 + $0x64] sm:$0xf] }
  0x27   : > { %v327_v33 = vshll.u32 %v3030_v27, 16  ;;  %v341_v34 = vshll.u32 %v2905_v11, 16  ;;  %v314_v25 = vor.u32 %v313_v22, %v309_v21  ;;  %v339_v41 = vrot.slane %v338_v61, 4  ;;  %v3047_v56 = vld [vmem:[%s2884_s19 + $0x68] sm:$0xf]  ;;  %v2665_v44 = vld [vmem:[%s3783_s3 + $0x10] sm:$0xff]  }
  0x28   : > { %v319_v38 = vrot.slane %v317_v23, 5  ;;  %v323_v40 = vrot.slane %v321_v24, 4  ;;  %v3040_v43 = vrot.slane %v502_v18, 4  ;;  %v310_v48 = vsel %vm3021_vm3, %v305_v19, %v309_v21  ;;  %v2663_v18 = vld [vmem:[%s3783_s3] sm:$0xff]   ;;  %v3062_v22 = vld [vmem:[%s2884_s19 + $0x70] sm:$0xf] }
  0x29   : > { %v343_v50 = vrot.slane %v341_v34, 5  ;;  %v315_v60 = vrot.slane %v314_v25, 4  ;;  %v329_v7 = vrot.slane %v327_v33, 5  ;;  %v347_v61 = vrot.slane %v345_v30, 4  ;;  %v3066_v30 = vld [vmem:[%s2884_s19 + $0x1c] sm:$0x1]  ;;  %2515 = vmatprep.subr.bf16.mxu1 %v2663_v18 }
  0x2a   : > { %v324_v2 = vor.u32 %v323_v40, %v319_v38  ;;  %v2284_v19 = vcombine.low %v2997_v1, %v3007_v8  ;;  %v3057_v21 = vrot.slane %v505_v32, 5  ;;  %v536_v24 = vshrl.u32 %v3062_v22, 16  ;;  %v3075_v25 = vld [vmem:[%s2884_s19 + $0x74] sm:$0xf] }
  0x2b   : > { %v344_v32 = vsel %vm3021_vm3, %v339_v41, %v343_v50  ;;  %v348_v23 = vor.u32 %v347_v61, %v343_v50  ;;  %v351_v47 = vshll.u32 %v2910_v15, 16  ;;  %v361_v41 = vshll.u32 %v3066_v30, 16 }
  0x2c   : > { %2470 = vmatmul.mubr.msk.bf16.gmra.mrb[8].mxu0 %vm630_vm0, %v2281_v3  ;;  %v2285_v3 = vcombine.low %v3011_v10, %v3038_v35  ;;  %v325_v33 = vrot.slane %v324_v2, 4  ;;  %v3086_v2 = vld [vmem:[%s2884_s19 + $0x78] sm:$0xf]  ;;  %v1071_v50 = vrot.slane %v2894_v6, 5  ;;  %v381_v34 = vrot.slane %v379_v39, 4 }
  0x2d   : > { %2473 = vmatprep.mubr.msk.bf16.mxu0 %vm630_vm0, %v2282_v4  ;;  %v320_v4 = vsel %vm3021_vm3, %v315_v60, %v319_v38  ;;  %v1039_v38 = vld [vmem:[%s2884_s19] sm:$0xe]  ;;  %v357_v60 = vrot.slane %v355_v36, 4  ;;  %v349_v61 = vrot.slane %v348_v23, 4  ;;  %v375_v36 = vshll.u32 %v2929_v26, 16 }
  0x2e   : > { %v2249_v40 = vcombine.low %v310_v48, %v320_v4  ;;  %v330_v9 = vsel %vm3021_vm3, %v325_v33, %v329_v7  ;;  %v353_v4 = vrot.slane %v351_v47, 5  ;;  %v1074_v7 = vrot.slane %v3030_v27, 5  ;;  %v1040_v33 = vld [vmem:[%s2884_s19 + $0x10] sm:$0xe] }
  0x2f   : > { %v2250_v48 = vcombine.low %v330_v9, %v344_v32  ;;  %v2303_v6 = vrot.slane %v1039_v38, 9  ;;  %v363_v47 = vrot.slane %v361_v41, 5  ;;  %v406_v23 = vor.u32 %v2980_v57, %v2974_v54  ;;  %v3118_v54 = vld [vmem:[%s2884_s19 + $0x2c] sm:$0x1] }
  0x30   : > { %2431 = vmatprep.mubr.msk.bf16.mxu1 %vm630_vm0, %v2249_v40  ;;  %v385_v40 = vshll.u32 %v2948_v37, 16  ;;  %v358_v9 = vor.u32 %v357_v60, %v353_v4  ;;  %v2286_v27 = vcombine.low %v3047_v56, %v3062_v22  ;;  %v373_v32 = vrot.slane %v372_v16, 4 }
  0x31   : > { %2432 = vmatmul.mubr.msk.bf16.vlgmr.msra.gmra.mrb[0].mxu1 %vm630_vm0, %v2250_v48  ;;  %v377_v38 = vrot.slane %v375_v36, 5  ;;  %v440_v53 = vor.u32 %v2993_v63, %v2991_v62  ;;  %v1073_v57 = vrot.slane %v1071_v50, 4  ;;  %v354_v60 = vsel %vm3021_vm3, %v349_v61, %v353_v4 }
  0x32   : > { %2516 = vmatpush3.bf16.msra.mxu1 %v2663_v18  ;;  %v359_v41 = vrot.slane %v358_v9, 4  ;;  %v2287_v49 = vcombine.low %v3075_v25, %v3086_v2  ;;  %v387_v48 = vrot.slane %v385_v40, 5  ;;  %v391_v18 = vrot.slane %v389_v45, 4 }
  0x33   : > { %2517 = vmatprep.subr.bf16.mxu1 %v2664_v14  ;;  %v382_v16 = vor.u32 %v381_v34, %v377_v38  ;;  %v1081_v4 = vrot.slane %v2910_v15, 5  ;;  %v378_v45 = vsel %vm3021_vm3, %v373_v32, %v377_v38  ;;  %v395_v40 = vshll.u32 %v3118_v54, 16 }
  0x34   : > { %2474 = vmatmul.mubr.msk.bf16.gmra.mrb[12].mxu0 %vm630_vm0, %v2283_v13  ;;  %v2304_v13 = vrot.slane %v1040_v33, 9  ;;  %v364_v61 = vsel %vm3021_vm3, %v359_v41, %v363_v47  ;;  %v474_v33 = vor.u32 %v3032_v28, %v3013_v12  ;;  %v392_v5 = vor.u32 %v391_v18, %v387_v48 }
  0x35   : > { %2477 = vmatprep.mubr.msk.bf16.mxu0 %vm630_vm0, %v2284_v19  ;;  %v3136_v19 = vsel %vm3110_vm6, %v2303_v6, %v1068_v17  ;;  %v2251_v34 = vcombine.low %v354_v60, %v364_v61  ;;  %v383_v36 = vrot.slane %v382_v16, 4  ;;  %v3148_v17 = vsel %vm3110_vm6, %v2936_v29, %v1071_v50  ;;  %v1041_v50 = vld [vmem:[%s2884_s19 + $0x20] sm:$0xe] }
  0x36   : > { %2518 = vmatpush3.bf16.msra.mxu1 %v2664_v14  ;;  %v407_v15 = vrot.slane %v406_v23, 4  ;;  %v409_v6 = vshll.u32 %v2953_v42, 16  ;;  %v3154_v9 = vsel %vm3110_vm6, %v1073_v57, %v1074_v7  ;;  %v3160_v14 = vsel %vm3110_vm6, %v2304_v13, %v1078_v31  ;;  %v3167_v23 = vld [vmem:[%s2884_s19 + $0x3c] sm:$0x1] }
  0x37   : > { %2519 = vmatprep.subr.bf16.mxu1 %v2665_v44  ;;  %2435 = vmatprep.mubr.msk.bf16.mxu1 %vm630_vm0, %v2251_v34  ;;  %v388_v29 = vsel %vm3021_vm3, %v383_v36, %v387_v48  ;;  %v393_v47 = vrot.slane %v392_v5, 4  ;;  %v2666_v7 = vld [vmem:[%s3783_s3 + $0x18] sm:$0xff]   ;;  %v1080_v38 = vrot.slane %v1078_v31, 4  ;;  %v397_v57 = vrot.slane %v395_v40, 5 }
  0x38   : > { %v2252_v32 = vcombine.low %v378_v45, %v388_v29  ;;  %v411_v13 = vrot.slane %v409_v6, 5  ;;  %v1083_v60 = vrot.slane %v1081_v4, 4  ;;  %v1084_v41 = vrot.slane %v3066_v30, 5  ;;  %v1042_v6 = vld [vmem:[%s2884_s19 + $0x30] sm:$0xe] }
  0x39   : > { %v415_v16 = vrot.slane %v413_v51, 4  ;;  %v419_v48 = vshll.u32 %v2962_v46, 16  ;;  %v1088_v11 = vrot.slane %v2929_v26, 5  ;;  %v398_v31 = vsel %vm3021_vm3, %v393_v47, %v397_v57  ;;  %v2667_v51 = vld [vmem:[%s3783_s3 + $0x20] sm:$0xff]   ;;  %v2668_v47 = vld [vmem:[%s3783_s3 + $0x28] sm:$0xff]  }
  0x3a   : > { %2520 = vmatpush3.bf16.msra.mxu1 %v2665_v44  ;;  %v412_v10 = vsel %vm3021_vm3, %v407_v15, %v411_v13  ;;  %v3196_v30 = vrot.slane %v536_v24, 4  ;;  %v2317_v18 = vcombine.low %v3136_v19, %v3148_v17  ;;  %v2318_v61 = vcombine.low %v3154_v9, %v3160_v14 }
  0x3b   : > { %2436 = vmatmul.mubr.msk.bf16.gmra.mrb[4].mxu1 %vm630_vm0, %v2252_v32  ;;  %v416_v44 = vor.u32 %v415_v16, %v411_v13  ;;  %v421_v26 = vrot.slane %v419_v48, 5  ;;  %2521 = vmatprep.subr.bf16.mxu1 %v2666_v7  ;;  %v429_v34 = vshll.u32 %v3167_v23, 16  ;;  %v3205_v45 = vsel %vm3110_vm6, %v1080_v38, %v1081_v4  ;;  %v3231_v13 = vld [vmem:[%s2884_s19 + $0x4c] sm:$0x1] }
  0x3c   : > { %2478 = vmatmul.mubr.msk.bf16.gmra.mrb[16].mxu0 %vm630_vm0, %v2285_v3  ;;  %v425_v3 = vrot.slane %v423_v52, 4  ;;  %v2305_v52 = vrot.slane %v1041_v50, 9  ;;  %v1091_v24 = vrot.slane %v2948_v37, 5  ;;  %v3211_v19 = vsel %vm3110_vm6, %v1083_v60, %v1084_v41 }
  0x3d   : > { %2481 = vmatprep.mubr.msk.bf16.mxu0 %vm630_vm0, %v2286_v27  ;;  %v2253_v27 = vcombine.low %v398_v31, %v412_v10  ;;  %v417_v36 = vrot.slane %v416_v44, 4  ;;  %v1090_v17 = vrot.slane %v1088_v11, 4  ;;  %v431_v40 = vrot.slane %v429_v34, 5 }
  0x3e   : > { %v426_v5 = vor.u32 %v425_v3, %v421_v26  ;;  %2522 = vmatpush3.bf16.msra.mxu1 %v2666_v7  ;;  %v443_v15 = vshll.u32 %v2977_v55, 16  ;;  %v449_v29 = vrot.slane %v447_v58, 4  ;;  %v453_v50 = vshll.u32 %v2984_v59, 16 }
  0x3f   : > { %2439 = vmatprep.mubr.msk.bf16.mxu1 %vm630_vm0, %v2253_v27  ;;  %2523 = vmatprep.subr.bf16.mxu1 %v2667_v51  ;;  %v422_v4 = vsel %vm3021_vm3, %v417_v36, %v421_v26  ;;  %v3225_v7 = vsel %vm3110_vm6, %v2305_v52, %v1088_v11  ;;  %v1093_v32 = vrot.slane %v1091_v24, 4  ;;  %v441_v38 = vrot.slane %v440_v53, 4  ;;  %v3264_v26 = vld [vmem:[%s2884_s19 + $0x5c] sm:$0x1] }
  0x40   : > { %v427_v37 = vrot.slane %v426_v5, 4  ;;  %v445_v57 = vrot.slane %v443_v15, 5  ;;  %v1094_v58 = vrot.slane %v3118_v54, 5  ;;  %v1098_v60 = vrot.slane %v2953_v42, 5 }
  0x41   : > { %v455_v16 = vrot.slane %v453_v50, 5  ;;  %v2319_v62 = vcombine.low %v3205_v45, %v3211_v19  ;;  %v1101_v53 = vrot.slane %v2962_v46, 5  ;;  %v3247_v54 = vsel %vm3110_vm6, %v1090_v17, %v1091_v24  ;;  %v1043_v45 = vld [vmem:[%s2884_s19 + $0x40] sm:$0xe] }
  0x42   : > { %v432_v41 = vsel %vm3021_vm3, %v427_v37, %v431_v40  ;;  %2524 = vmatpush3.bf16.msra.mxu1 %v2667_v51  ;;  %v450_v48 = vor.u32 %v449_v29, %v445_v57  ;;  %v2306_v42 = vrot.slane %v1042_v6, 9  ;;  %v463_v11 = vshll.u32 %v3231_v13, 16 }
  0x43   : > { %v2254_v63 = vcombine.low %v422_v4, %v432_v41  ;;  %2525 = vmatprep.subr.bf16.mxu1 %v2668_v47  ;;  %v446_v31 = vsel %vm3021_vm3, %v441_v38, %v445_v57  ;;  %v475_v10 = vrot.slane %v474_v33, 4  ;;  %v477_v3 = vshll.u32 %v2997_v1, 16 }
  0x44   : > { %2482 = vmatmul.mubr.msk.bf16.gmra.mrb[20].mxu0 %vm630_vm0, %v2287_v49  ;;  %v459_v49 = vrot.slane %v457_v0, 4  ;;  %v451_v46 = vrot.slane %v450_v48, 4  ;;  %v3261_v51 = vsel %vm3110_vm6, %v1093_v32, %v1094_v58  ;;  %v1100_v0 = vrot.slane %v1098_v60, 4 }
  0x45   : > { %2491 = vmatprep.mubr.msk.bf16.mxu0 %vm630_vm0, %v2317_v18  ;;  %2440 = vmatmul.mubr.msk.bf16.gmra.mrb[8].mxu1 %vm630_vm0, %v2254_v63  ;;  %v465_v44 = vrot.slane %v463_v11, 5  ;;  %v1103_v18 = vrot.slane %v1101_v53, 4  ;;  %v1104_v52 = vrot.slane %v3167_v23, 5  ;;  %v479_v12 = vrot.slane %v477_v3, 5 }
  0x46   : > { %v460_v27 = vor.u32 %v459_v49, %v455_v16  ;;  %2526 = vmatpush3.bf16.msra.mxu1 %v2668_v47  ;;  %v456_v34 = vsel %vm3021_vm3, %v451_v46, %v455_v16  ;;  %v1099_v28 = vsel %vm3110_vm6, %v2306_v42, %v1098_v60  ;;  %v3812_v36 = vshrl.u32 %v2997_v1, 16  ;;  %v3316_v46 = vld [vmem:[%s2884_s19 + $0x6c] sm:$0x1] }
  0x47   : > { %v2255_v33 = vcombine.low %v446_v31, %v456_v34  ;;  %v480_v19 = vsel %vm3021_vm3, %v475_v10, %v479_v12  ;;  %v487_v17 = vshll.u32 %v3007_v8, 16  ;;  %v3813_v23 = vshrl.u32 %v3007_v8, 16 }
  0x48   : > { %v461_v24 = vrot.slane %v460_v27, 4  ;;  %v483_v5 = vrot.slane %v3812_v36, 4  ;;  %v497_v15 = vshll.u32 %v3264_v26, 16  ;;  %v3286_v6 = vsel %vm3110_vm6, %v1100_v0, %v1101_v53 }
  0x49   : > { %v493_v40 = vrot.slane %v3813_v23, 4  ;;  %2443 = vmatprep.mubr.msk.bf16.mxu1 %vm630_vm0, %v2255_v33  ;;  %v1108_v4 = vrot.slane %v2977_v55, 5  ;;  %v3295_v50 = vsel %vm3110_vm6, %v1103_v18, %v1104_v52  ;;  %v2307_v9 = vrot.slane %v1043_v45, 9 }
  0x4a   : > { %v466_v37 = vsel %vm3021_vm3, %v461_v24, %v465_v44  ;;  %v484_v29 = vor.u32 %v483_v5, %v479_v12  ;;  %v1111_v47 = vrot.slane %v2984_v59, 5  ;;  %v499_v38 = vrot.slane %v497_v15, 5  ;;  %v1044_v44 = vld [vmem:[%s2884_s19 + $0x50] sm:$0xe] }
  0x4b   : > { %v2256_v14 = vcombine.low %v466_v37, %v480_v19  ;;  %v508_v55 = vor.u32 %v3057_v21, %v3040_v43  ;;  %v511_v58 = vshll.u32 %v3038_v35, 16  ;;  %v3814_v60 = vshrl.u32 %v3038_v35, 16 }
  0x4c   : > { %2492 = vmatmul.mubr.msk.bf16.vlgmr.msra.gmra.mrb[0].mxu0 %vm630_vm0, %v2318_v61  ;;  %v489_v61 = vrot.slane %v487_v17, 5  ;;  %v485_v32 = vrot.slane %v484_v29, 4  ;;  %v521_v16 = vshll.u32 %v3047_v56, 16  ;;  %v2320_v59 = vcombine.low %v3225_v7, %v3247_v54 }
  0x4d   : > { %2495 = vmatprep.mubr.msk.bf16.mxu0 %vm630_vm0, %v2319_v62  ;;  %2444 = vmatmul.mubr.msk.bf16.gmra.mrb[12].mxu1 %vm630_vm0, %v2256_v14  ;;  %v517_v41 = vrot.slane %v3814_v60, 4  ;;  %v3815_v62 = vshll.u32 %v3062_v22, 16  ;;  %v1110_v53 = vrot.slane %v1108_v4, 4  ;;  %v509_v48 = vrot.slane %v508_v55, 4  ;;  %v1045_v60 = vld [vmem:[%s2884_s19 + $0x60] sm:$0xe] }
  0x4e   : > { %v494_v57 = vor.u32 %v493_v40, %v489_v61  ;;  %v2321_v43 = vcombine.low %v3261_v51, %v1099_v28  ;;  %v490_v21 = vsel %vm3021_vm3, %v485_v32, %v489_v61  ;;  %v513_v49 = vrot.slane %v511_v58, 5 }
  0x4f   : > { %v541_v63 = vrot.slane %v3815_v62, 5  ;;  %v559_v11 = vshrl.u32 %v3086_v2, 16  ;;  %v2322_v31 = vcombine.low %v3286_v6, %v3295_v50  ;;  %v523_v22 = vrot.slane %v521_v16, 5  ;;  %v293_v6 = vld [vmem:[%s2884_s19 + $0x7c] sm:$0x1] }
  0x50   : > { %v495_v42 = vrot.slane %v494_v57, 4  ;;  %v3816_v7 = vshrl.u32 %v3047_v56, 16  ;;  %v1109_v10 = vsel %vm3110_vm6, %v2307_v9, %v1108_v4  ;;  %v1113_v3 = vrot.slane %v1111_v47, 4 }
  0x51   : > { %v518_v0 = vor.u32 %v517_v41, %v513_v49  ;;  %v1112_v27 = vsel %vm3110_vm6, %v1110_v53, %v1111_v47  ;;  %v514_v52 = vsel %vm3021_vm3, %v509_v48, %v513_v49  ;;  %v531_v28 = vshll.u32 %v3316_v46, 16 }
  0x52   : > { %v527_v54 = vrot.slane %v3816_v7, 4  ;;  %v500_v51 = vsel %vm3021_vm3, %v495_v42, %v499_v38  ;;  %v542_v33 = vor.u32 %v541_v63, %v3196_v30  ;;  %v545_v45 = vshll.u32 %v3075_v25, 16 }
  0x53   : > { %v2257_v18 = vcombine.low %v490_v21, %v500_v51  ;;  %v519_v12 = vrot.slane %v518_v0, 4  ;;  %v1114_v24 = vrot.slane %v3231_v13, 5  ;;  %v1118_v36 = vrot.slane %v2997_v1, 5 }
  0x54   : > { %2496 = vmatmul.mubr.msk.bf16.gmra.mrb[4].mxu0 %vm630_vm0, %v2320_v59  ;;  %v528_v34 = vor.u32 %v527_v54, %v523_v22  ;;  %v1121_v5 = vrot.slane %v3007_v8, 5  ;;  %v2308_v17 = vrot.slane %v1044_v44, 9  ;;  %v533_v40 = vrot.slane %v531_v28, 5 }
  0x55   : > { %2499 = vmatprep.mubr.msk.bf16.mxu0 %vm630_vm0, %v2321_v43  ;;  %2447 = vmatprep.mubr.msk.bf16.mxu1 %vm630_vm0, %v2257_v18  ;;  %v524_v23 = vsel %vm3021_vm3, %v519_v12, %v523_v22  ;;  %v543_v15 = vrot.slane %v542_v33, 4  ;;  %v2323_v4 = vcombine.low %v1109_v10, %v1112_v27  ;;  %v1120_v30 = vrot.slane %v1118_v36, 4  ;;  %v1046_v43 = vld [vmem:[%s2884_s19 + $0x70] sm:$0xe] }
  0x56   : > { %v529_v19 = vrot.slane %v528_v34, 4  ;;  %v2258_v37 = vcombine.low %v514_v52, %v524_v23  ;;  %v547_v29 = vrot.slane %v545_v45, 5  ;;  %v1124_v13 = vrot.slane %v3264_v26, 5  ;;  %v2669_v33 = vld [vmem:[%s3783_s3 + $0x30] sm:$0xff]   ;;  %v2670_v45 = vld [vmem:[%s3783_s3 + $0x38] sm:$0xff]  }
  0x57   : > { %v3817_v8 = vshrl.u32 %v3075_v25, 16  ;;  %v555_v9 = vshll.u32 %v3086_v2, 16  ;;  %v1123_v14 = vrot.slane %v1121_v5, 4  ;;  %v561_v47 = vrot.slane %v559_v11, 4  ;;  %2527 = vmatprep.subr.bf16.mxu1 %v2669_v33 }
  0x58   : > { %v534_v1 = vsel %vm3021_vm3, %v529_v19, %v533_v40  ;;  %2448 = vmatmul.mubr.msk.bf16.gmra.mrb[16].mxu1 %vm630_vm0, %v2258_v37  ;;  %v548_v61 = vsel %vm3021_vm3, %v543_v15, %v547_v29  ;;  %v565_v32 = vshll.u32 %v293_v6, 16  ;;  %v1115_v57 = vsel %vm3110_vm6, %v1113_v3, %v1114_v24 }
  0x59   : > { %v551_v50 = vrot.slane %v3817_v8, 4  ;;  %v2259_v38 = vcombine.low %v534_v1, %v548_v61  ;;  %v557_v55 = vrot.slane %v555_v9, 5  ;;  %v1119_v58 = vsel %vm3110_vm6, %v2308_v17, %v1118_v36  ;;  %2528 = vmatpush3.bf16.msra.mxu1 %v2669_v33 }
  0x5a   : > { %v1128_v41 = vrot.slane %v3038_v35, 5  ;;  %v567_v63 = vrot.slane %v565_v32, 5  ;;  %v1122_v59 = vsel %vm3110_vm6, %v1120_v30, %v1121_v5  ;;  %v1125_v53 = vsel %vm3110_vm6, %v1123_v14, %v1124_v13  ;;  %2529 = vmatprep.subr.bf16.mxu1 %v2670_v45  ;;  %v3399_v13 = vld [vmem:[%s3782_s2] ss:$0 sm:$0xff] }
  0x5b   : > { %v552_v26 = vor.u32 %v551_v50, %v547_v29  ;;  %2451 = vmatprep.mubr.msk.bf16.mxu1 %vm630_vm0, %v2259_v38  ;;  %v562_v62 = vor.u32 %v561_v47, %v557_v55  ;;  %v1131_v48 = vrot.slane %v3047_v56, 5  ;;  %v2324_v49 = vcombine.low %v1115_v57, %v1119_v58 }
  0x5c   : > { %2500 = vmatmul.mubr.msk.bf16.gmra.mrb[8].mxu0 %vm630_vm0, %v2322_v31  ;;  %v2309_v35 = vrot.slane %v1045_v60, 9  ;;  %v2325_v11 = vcombine.low %v1122_v59, %v1125_v53  ;;  %v1130_v31 = vrot.slane %v1128_v41, 4  ;;  %v1134_v54 = vrot.slane %v3316_v46, 5 }
  0x5d   : > { %2503 = vmatprep.mubr.msk.bf16.mxu0 %vm630_vm0, %v2323_v4  ;;  %v553_v16 = vrot.slane %v552_v26, 4  ;;  %v563_v42 = vrot.slane %v562_v62, 4  ;;  %v1133_v22 = vrot.slane %v1131_v48, 4  ;;  %v2310_v10 = vrot.slane %v1046_v43, 9  ;;  %2530 = vmatpush3.bf16.msra.mxu1 %v2670_v45 }
  0x5e   : > { %v1138_v3 = vrot.slane %v3075_v25, 5  ;;  %v1129_v56 = vsel %vm3110_vm6, %v2309_v35, %v1128_v41  ;;  %v1132_v0 = vsel %vm3110_vm6, %v1130_v31, %v1131_v48  ;;  %v1141_v20 = vrot.slane %v3086_v2, 5 }
  0x5f   : > { %v558_v21 = vsel %vm3021_vm3, %v553_v16, %v557_v55  ;;  %v568_v7 = vsel %vm3021_vm3, %v563_v42, %v567_v63  ;;  %v1135_v46 = vsel %vm3110_vm6, %v1133_v22, %v1134_v54  ;;  %v2326_v27 = vcombine.low %v1129_v56, %v1132_v0 }
  0x60   : > { %v2260_v51 = vcombine.low %v558_v21, %v568_v7  ;;  %v1139_v25 = vsel %vm3110_vm6, %v2310_v10, %v1138_v3  ;;  %v1140_v18 = vrot.slane %v1138_v3, 4  ;;  %v1143_v52 = vrot.slane %v1141_v20, 4 }
  0x61   : > { %v2327_v44 = vcombine.low %v1135_v46, %v1139_v25  ;;  %v1144_v34 = vrot.slane %v293_v6, 5 }
  0x62   : > { %2452 = vmatmul.mubr.msk.bf16.gmra.mrb[20].mxu1 %vm630_vm0, %v2260_v51  ;;  %v1142_v12 = vsel %vm3110_vm6, %v1140_v18, %v1141_v20 }
  0x63   : > { %v1145_v2 = vsel %vm3110_vm6, %v1143_v52, %v1144_v34 }
  0x64   : > { %2504 = vmatmul.mubr.msk.bf16.gmra.mrb[12].mxu0 %vm630_vm0, %v2324_v49  ;;  %v2328_v28 = vcombine.low %v1142_v12, %v1145_v2 }
  0x65   : > { %2507 = vmatprep.mubr.msk.bf16.mxu0 %vm630_vm0, %v2325_v11 }
  0x6c   : > { %2508 = vmatmul.mubr.msk.bf16.gmra.mrb[16].mxu0 %vm630_vm0, %v2326_v27 }
  0x6d   : > { %2511 = vmatprep.mubr.msk.bf16.mxu0 %vm630_vm0, %v2327_v44 }
  0x74   : > { %2512 = vmatmul.mubr.msk.bf16.gmra.mrb[20].mxu0 %vm630_vm0, %v2328_v28 }
 0x104   : > { %v2433_v24 = vpop.f32.mrb[0].mxu1 }
 0x105   : > { %v701_v36 = vpop.f32.mrb[1].mxu1 }
 0x106   : > { %v2434_v5 = vpop.f32.mrb[2].mxu1 }
 0x107   : > { %v704_v39 = vpop.f32.mrb[3].mxu1 }
 0x10e   : > { %v2437_v19 = vpop.f32.mrb[4].mxu1 }
 0x10f   : > { %v717_v17 = vpop.f32.mrb[5].mxu1 }
 0x110   : > { %v2438_v23 = vpop.f32.mrb[6].mxu1 }
 0x111   : > { %v720_v40 = vpop.f32.mrb[7].mxu1 }
 0x118   : > { %v2441_v15 = vpop.f32.mrb[8].mxu1 }
 0x119   : > { %v733_v6 = vpop.f32.mrb[9].mxu1 }
 0x11a   : > { %v2442_v4 = vpop.f32.mrb[10].mxu1 }
 0x11b   : > { %v736_v30 = vpop.f32.mrb[11].mxu1 }
 0x11f   : > { %v2493_v37 = vpop.f32.mrb[0].mxu0 }
 0x120   : > { %v2555_v29 = vadd.f32 %v2493_v37, %v2433_v24  ;;  %v1277_v1 = vpop.f32.mrb[1].mxu0  ;;  %v2445_v61 = vpop.f32.mrb[12].mxu1 }
 0x121   : > { %v2556_v8 = vadd.f32 %v1277_v1, %v701_v36  ;;  %v2494_v50 = vpop.f32.mrb[2].mxu0  ;;  %v749_v38 = vpop.f32.mrb[13].mxu1 }
 0x122   : > { %v2557_v9 = vadd.f32 %v2494_v50, %v2434_v5  ;;  %v1280_v14 = vpop.f32.mrb[3].mxu0  ;;  %v3405_v26 = vadd.f32 %v2555_v29, %v3399_v13  ;;  %v2446_v57 = vpop.f32.mrb[14].mxu1 }
 0x123   : > { %v3402_v47 = vadd.f32 %v2556_v8, %v3399_v13  ;;  %v2558_v32 = vadd.f32 %v1280_v14, %v704_v39  ;;  %v3413_v60 = vpop.f32.mrb[15].mxu1 }
 0x124   : > { %v3408_v55 = vadd.f32 %v2557_v9, %v3399_v13  ;;  %v3804_v59 = vmax.f32 %v3405_v26, 0.0 }
 0x125   : > { %v3411_v58 = vadd.f32 %v2558_v32, %v3399_v13  ;;  %v1427_v16 = vmax.f32 %v3402_v47, 0.0 }
 0x126   : > { %v1430_v41 = vmax.f32 %v3408_v55, 0.0 }
 0x127   : > { %v1428_v62 = vmax.f32 %v3411_v58, 0.0  ;;  %v2497_v63 = vpop.f32.mrb[4].mxu0 }
 0x128   : > { %v2559_v53 = vadd.f32 %v2497_v63, %v2437_v19  ;;  %v1293_v48 = vpop.f32.mrb[5].mxu0  ;;  %v1452_v49 = vpack.c.bf16 %v1430_v41, %v3804_v59 }
 0x129   : > { %v2560_v43 = vadd.f32 %v1293_v48, %v717_v17  ;;  %v2498_v21 = vpop.f32.mrb[6].mxu0  ;;  %v1451_v42 = vpack.c.bf16 %v1428_v62, %v1427_v16 }
 0x12a   : > { %v2561_v35 = vadd.f32 %v2498_v21, %v2438_v23  ;;  %v1296_v11 = vpop.f32.mrb[7].mxu0  ;;  %v3431_v7 = vadd.f32 %v2559_v53, %v3399_v13 }
 0x12b   : > { %v3428_v31 = vadd.f32 %v2560_v43, %v3399_v13  ;;  %v2562_v22 = vadd.f32 %v1296_v11, %v720_v40  ;;  %2531 = vmatprep.mubr.bf16.mxu1 %v1451_v42  ;;  %v2449_v3 = vpop.f32.mrb[16].mxu1 }
 0x12c   : > { %v3434_v54 = vadd.f32 %v2561_v35, %v3399_v13  ;;  %2532 = vmatmul.mubr.bf16.vlgmr.msra.gmra.mrb[24].mxu1 %v1452_v49  ;;  %v765_v56 = vpop.f32.mrb[17].mxu1  ;;  %v3803_v27 = vmax.f32 %v3431_v7, 0.0  ;;  %v3820_v55 = vmax.f32 %v3431_v7, 0.0 }
 0x12d   : > { %v3437_v10 = vadd.f32 %v2562_v22, %v3399_v13  ;;  %v1431_v0 = vmax.f32 %v3428_v31, 0.0  ;;  %v2450_v25 = vpop.f32.mrb[18].mxu1  ;;  %v3819_v31 = vmax.f32 %v3405_v26, 0.0 }
 0x12e   : > { %v3805_v51 = vmax.f32 %v3434_v54, 0.0  ;;  %v768_v52 = vpop.f32.mrb[19].mxu1 }
 0x12f   : > { %v1432_v20 = vmax.f32 %v3437_v10, 0.0  ;;  %v2501_v46 = vpop.f32.mrb[8].mxu0 }
 0x130   : > { %v2563_v44 = vadd.f32 %v2501_v46, %v2441_v15  ;;  %v1309_v18 = vpop.f32.mrb[9].mxu0  ;;  %v1454_v45 = vpack.c.bf16 %v3805_v51, %v3803_v27 }
 0x131   : > { %v2564_v34 = vadd.f32 %v1309_v18, %v733_v6  ;;  %v2502_v12 = vpop.f32.mrb[10].mxu0  ;;  %v1453_v2 = vpack.c.bf16 %v1432_v20, %v1431_v0 }
 0x132   : > { %v2565_v28 = vadd.f32 %v2502_v12, %v2442_v4  ;;  %v1312_v33 = vpop.f32.mrb[11].mxu0  ;;  %v3455_v5 = vadd.f32 %v2563_v44, %v3399_v13 }
 0x133   : > { %v3452_v24 = vadd.f32 %v2564_v34, %v3399_v13  ;;  %v2566_v36 = vadd.f32 %v1312_v33, %v736_v30  ;;  %2535 = vmatprep.mubr.bf16.mxu1 %v1453_v2 }
 0x134   : > { %v3458_v39 = vadd.f32 %v2565_v28, %v3399_v13  ;;  %2536 = vmatmul.mubr.bf16.gmra.mrb[28].mxu1 %v1454_v45  ;;  %v3801_v4 = vmax.f32 %v3455_v5, 0.0  ;;  %v3822_v47 = vmax.f32 %v3455_v5, 0.0 }
 0x135   : > { %v3461_v19 = vadd.f32 %v2566_v36, %v3399_v13  ;;  %v3802_v23 = vmax.f32 %v3452_v24, 0.0  ;;  %v2453_v6 = vpop.f32.mrb[20].mxu1 }
 0x136   : > { %v3797_v17 = vmax.f32 %v3458_v39, 0.0  ;;  %v781_v29 = vpop.f32.mrb[21].mxu1 }
 0x137   : > { %v3799_v40 = vmax.f32 %v3461_v19, 0.0  ;;  %v2505_v15 = vpop.f32.mrb[12].mxu0  ;;  %v2454_v9 = vpop.f32.mrb[22].mxu1  ;;  %v3824_v26 = vmax.f32 %v3461_v19, 0.0 }
 0x138   : > { %v2567_v30 = vadd.f32 %v2505_v15, %v2445_v61  ;;  %v1325_v37 = vpop.f32.mrb[13].mxu0  ;;  %v1456_v63 = vpack.c.bf16 %v3797_v17, %v3801_v4  ;;  %v784_v53 = vpop.f32.mrb[23].mxu1 }
 0x139   : > { %v2568_v1 = vadd.f32 %v1325_v37, %v749_v38  ;;  %v2506_v8 = vpop.f32.mrb[14].mxu0  ;;  %v1455_v50 = vpack.c.bf16 %v3799_v40, %v3802_v23 }
 0x13a   : > { %v2569_v14 = vadd.f32 %v2506_v8, %v2446_v57  ;;  %v1328_v32 = vpop.f32.mrb[15].mxu0  ;;  %v3480_v48 = vadd.f32 %v2567_v30, %v3399_v13 }
 0x13b   : > { %v3476_v61 = vadd.f32 %v2568_v1, %v3399_v13  ;;  %v2570_v38 = vadd.f32 %v1328_v32, %v3413_v60  ;;  %2539 = vmatprep.mubr.bf16.mxu1 %v1455_v50 }
 0x13c   : > { %v3483_v43 = vadd.f32 %v2569_v14, %v3399_v13  ;;  %2540 = vmatmul.mubr.bf16.gmra.mrb[32].mxu1 %v1456_v63  ;;  %v3796_v60 = vmax.f32 %v3480_v48, 0.0 }
 0x13d   : > { %v3486_v57 = vadd.f32 %v2570_v38, %v3399_v13  ;;  %v3800_v42 = vmax.f32 %v3476_v61, 0.0 }
 0x13e   : > { %v3793_v21 = vmax.f32 %v3483_v43, 0.0 }
 0x13f   : > { %v3798_v49 = vmax.f32 %v3486_v57, 0.0  ;;  %v2509_v35 = vpop.f32.mrb[16].mxu0 }
 0x140   : > { %v2571_v11 = vadd.f32 %v2509_v35, %v2449_v3  ;;  %v1341_v22 = vpop.f32.mrb[17].mxu0  ;;  %v1458_v2 = vpack.c.bf16 %v3793_v21, %v3796_v60 }
 0x141   : > { %v2572_v46 = vadd.f32 %v1341_v22, %v765_v56  ;;  %v2510_v44 = vpop.f32.mrb[18].mxu0  ;;  %v1457_v18 = vpack.c.bf16 %v3798_v49, %v3800_v42 }
 0x142   : > { %v2573_v34 = vadd.f32 %v2510_v44, %v2450_v25  ;;  %v1344_v12 = vpop.f32.mrb[19].mxu0  ;;  %v3504_v3 = vadd.f32 %v2571_v11, %v3399_v13 }
 0x143   : > { %v3501_v28 = vadd.f32 %v2572_v46, %v3399_v13  ;;  %v2574_v33 = vadd.f32 %v1344_v12, %v768_v52  ;;  %2543 = vmatprep.mubr.bf16.mxu1 %v1457_v18 }
 0x144   : > { %v3507_v56 = vadd.f32 %v2573_v34, %v3399_v13  ;;  %2544 = vmatmul.mubr.bf16.gmra.mrb[36].mxu1 %v1458_v2  ;;  %v3794_v52 = vmax.f32 %v3504_v3, 0.0 }
 0x145   : > { %v3510_v25 = vadd.f32 %v2574_v33, %v3399_v13  ;;  %v3795_v36 = vmax.f32 %v3501_v28, 0.0 }
 0x146   : > { %v3792_v45 = vmax.f32 %v3507_v56, 0.0 }
 0x147   : > { %v3791_v15 = vmax.f32 %v3510_v25, 0.0  ;;  %v2513_v30 = vpop.f32.mrb[20].mxu0 }
 0x148   : > { %v2575_v37 = vadd.f32 %v2513_v30, %v2453_v6  ;;  %v1357_v1 = vpop.f32.mrb[21].mxu0  ;;  %v1460_v38 = vpack.c.bf16 %v3792_v45, %v3794_v52 }
 0x149   : > { %v2576_v8 = vadd.f32 %v1357_v1, %v781_v29  ;;  %v2514_v50 = vpop.f32.mrb[22].mxu0  ;;  %v1459_v14 = vpack.c.bf16 %v3791_v15, %v3795_v36 }
 0x14a   : > { %v2577_v32 = vadd.f32 %v2514_v50, %v2454_v9  ;;  %v1360_v63 = vpop.f32.mrb[23].mxu0  ;;  %v3528_v6 = vadd.f32 %v2575_v37, %v3399_v13 }
 0x14b   : > { %v3525_v35 = vadd.f32 %v2576_v8, %v3399_v13  ;;  %v2578_v11 = vadd.f32 %v1360_v63, %v784_v53  ;;  %2547 = vmatprep.mubr.bf16.mxu1 %v1459_v14 }
 0x14c   : > { %v3531_v29 = vadd.f32 %v2577_v32, %v3399_v13  ;;  %2548 = vmatmul.mubr.bf16.gmra.mrb[40].mxu1 %v1460_v38  ;;  %v3789_v18 = vmax.f32 %v3528_v6, 0.0 }
 0x14d   : > { %v3534_v9 = vadd.f32 %v2578_v11, %v3399_v13  ;;  %v3790_v46 = vmax.f32 %v3525_v35, 0.0  ;;  %v3551_v13 = vld [vmem:[%s3784_s4] ss:$0 sm:$0xff] }
 0x14e   : > { %v3787_v22 = vmax.f32 %v3531_v29, 0.0 }
 0x14f   : > { %v3788_v44 = vmax.f32 %v3534_v9, 0.0 }
 0x150   : > { %v1462_v34 = vpack.c.bf16 %v3787_v22, %v3789_v18 }
 0x151   : > { %v1461_v53 = vpack.c.bf16 %v3788_v44, %v3790_v46 }
 0x153   : > { %2551 = vmatprep.mubr.bf16.mxu1 %v1461_v53 }
 0x154   : > { %2552 = vmatmul.mubr.bf16.gmra.mrb[44].mxu1 %v1462_v34 }
 0x1ff   : > { %v2533_v12 = vpop.f32.mrb[24].mxu1 }
 0x200   : > { %v1577_v2 = vadd.f32 %v2533_v12, %v3551_v13  ;;  %v1568_v33 = vpop.f32.mrb[25].mxu1  ;;  %v3563_v12 = vld [vmem:[%s3785_s5] ss:$0 sm:$0xff] }
 0x201   : > { %v1569_v30 = vadd.f32 %v3551_v13, %v1568_v33  ;;  %v2534_v37 = vpop.f32.mrb[26].mxu1 }
 0x202   : > { %2671 = vtanh.f32 %v1577_v2  ;;  %v1580_v1 = vadd.f32 %v2534_v37, %v3551_v13  ;;  %v1571_v8 = vpop.f32.mrb[27].mxu1 }
 0x203   : > { %2673 = vtanh.f32 %v1569_v30  ;;  %v1572_v50 = vadd.f32 %v3551_v13, %v1571_v8 }
 0x204   : > { %2675 = vtanh.f32 %v1580_v1 }
 0x205   : > { %2677 = vtanh.f32 %v1572_v50 }
 0x207   : > { %v2537_v14 = vpop.f32.mrb[28].mxu1 }
 0x208   : > { %v1593_v32 = vadd.f32 %v2537_v14, %v3551_v13  ;;  %v1584_v63 = vpop.f32.mrb[29].mxu1 }
 0x209   : > { %v1585_v38 = vadd.f32 %v3551_v13, %v1584_v63  ;;  %v2538_v11 = vpop.f32.mrb[30].mxu1 }
 0x20a   : > { %v1596_v53 = vadd.f32 %v2538_v11, %v3551_v13  ;;  %v1587_v34 = vpop.f32.mrb[31].mxu1 }
 0x20b   : > { %2679 = vtanh.f32 %v1585_v38  ;;  %v1588_v30 = vadd.f32 %v3551_v13, %v1587_v34 }
 0x20c   : > { %v2672_v2 = vpop.eup %2671  ;;  %2681 = vtanh.f32 %v1593_v32 }
 0x20d   : > { %v2674_v33 = vpop.eup %2673  ;;  %2683 = vtanh.f32 %v1596_v53  ;;  %v1696_v37 = vmul.f32 %v2672_v2, %v3563_v12 }
 0x20e   : > { %v2676_v1 = vpop.eup %2675  ;;  %2685 = vtanh.f32 %v1588_v30  ;;  %v1694_v32 = vmul.f32 %v2674_v33, %v3563_v12 }
 0x20f   : > { %1722 = vadd.xlane.f32.xlu0 %v1696_v37  ;;  %v2541_v8 = vpop.f32.mrb[32].mxu1  ;;  %v1697_v50 = vmul.f32 %v2676_v1, %v3563_v12  ;;  %v2678_v53 = vpop.eup %2677 }
 0x210   : > { %v1609_v14 = vadd.f32 %v2541_v8, %v3551_v13  ;;  %v1600_v63 = vpop.f32.mrb[33].mxu1  ;;  %v1695_v8 = vmul.f32 %v2678_v53, %v3563_v12 }
 0x211   : > { %v1601_v11 = vadd.f32 %v3551_v13, %v1600_v63  ;;  %1724 = vadd.xlane.f32.xlu1 %v1697_v50  ;;  %v2542_v38 = vpop.f32.mrb[34].mxu1 }
 0x212   : > { %2687 = vtanh.f32 %v1609_v14  ;;  %v1612_v34 = vadd.f32 %v2542_v38, %v3551_v13  ;;  %v1603_v2 = vpop.f32.mrb[35].mxu1 }
 0x213   : > { %1718 = vadd.xlane.f32.xlu0 %v1694_v32  ;;  %2689 = vtanh.f32 %v1601_v11  ;;  %v1604_v1 = vadd.f32 %v3551_v13, %v1603_v2 }
 0x214   : > { %2691 = vtanh.f32 %v1612_v34 }
 0x215   : > { %v2680_v37 = vpop.eup %2679  ;;  %2693 = vtanh.f32 %v1604_v1 }
 0x216   : > { %v2682_v30 = vpop.eup %2681  ;;  %v1698_v63 = vmul.f32 %v2680_v37, %v3563_v12 }
 0x217   : > { %v2684_v50 = vpop.eup %2683  ;;  %v2545_v22 = vpop.f32.mrb[36].mxu1  ;;  %1720 = vadd.xlane.f32.xlu0 %v1695_v8  ;;  %v1700_v32 = vmul.f32 %v2682_v30, %v3563_v12 }
 0x218   : > { %v1625_v33 = vadd.f32 %v2545_v22, %v3551_v13  ;;  %v1616_v14 = vpop.f32.mrb[37].mxu1  ;;  %1726 = vadd.xlane.f32.xlu1 %v1698_v63  ;;  %v1701_v2 = vmul.f32 %v2684_v50, %v3563_v12  ;;  %v2686_v37 = vpop.eup %2685 }
 0x219   : > { %v1617_v38 = vadd.f32 %v3551_v13, %v1616_v14  ;;  %v2546_v11 = vpop.f32.mrb[38].mxu1  ;;  %v1699_v63 = vmul.f32 %v2686_v37, %v3563_v12 }
 0x21a   : > { %2695 = vtanh.f32 %v1625_v33  ;;  %v1628_v34 = vadd.f32 %v2546_v11, %v3551_v13  ;;  %v1619_v53 = vpop.f32.mrb[39].mxu1 }
 0x21b   : > { %1730 = vadd.xlane.f32.xlu0 %v1700_v32  ;;  %2697 = vtanh.f32 %v1617_v38  ;;  %v1620_v22 = vadd.f32 %v3551_v13, %v1619_v53 }
 0x21c   : > { %v2688_v44 = vpop.eup %2687  ;;  %1732 = vadd.xlane.f32.xlu1 %v1701_v2  ;;  %2699 = vtanh.f32 %v1628_v34 }
 0x21d   : > { %v1704_v1 = vmul.f32 %v2688_v44, %v3563_v12  ;;  %v2690_v8 = vpop.eup %2689  ;;  %2701 = vtanh.f32 %v1620_v22 }
 0x21e   : > { %v2692_v30 = vpop.eup %2691  ;;  %v1702_v32 = vmul.f32 %v2690_v8, %v3563_v12 }
 0x21f   : > { %v2549_v33 = vpop.f32.mrb[40].mxu1  ;;  %1738 = vadd.xlane.f32.xlu0 %v1704_v1  ;;  %v1705_v53 = vmul.f32 %v2692_v30, %v3563_v12  ;;  %v2694_v2 = vpop.eup %2693 }
 0x220   : > { %v1641_v14 = vadd.f32 %v2549_v33, %v3551_v13  ;;  %v1632_v11 = vpop.f32.mrb[41].mxu1  ;;  %1728 = vadd.xlane.f32.xlu1 %v1699_v63  ;;  %v1703_v33 = vmul.f32 %v2694_v2, %v3563_v12 }
 0x221   : > { %v1633_v50 = vadd.f32 %v3551_v13, %v1632_v11  ;;  %v2550_v38 = vpop.f32.mrb[42].mxu1 }
 0x222   : > { %2703 = vtanh.f32 %v1641_v14  ;;  %v1644_v34 = vadd.f32 %v2550_v38, %v3551_v13  ;;  %v1635_v44 = vpop.f32.mrb[43].mxu1 }
 0x223   : > { %1734 = vadd.xlane.f32.xlu0 %v1702_v32  ;;  %2705 = vtanh.f32 %v1633_v50  ;;  %v1636_v1 = vadd.f32 %v3551_v13, %v1635_v44 }
 0x224   : > { %v2696_v37 = vpop.eup %2695  ;;  %1740 = vadd.xlane.f32.xlu1 %v1705_v53  ;;  %2707 = vtanh.f32 %v1644_v34 }
 0x225   : > { %v1708_v22 = vmul.f32 %v2696_v37, %v3563_v12  ;;  %v2698_v63 = vpop.eup %2697  ;;  %2709 = vtanh.f32 %v1636_v1 }
 0x226   : > { %v2700_v8 = vpop.eup %2699  ;;  %v1706_v32 = vmul.f32 %v2698_v63, %v3563_v12 }
 0x227   : > { %1746 = vadd.xlane.f32.xlu0 %v1708_v22  ;;  %v2553_v14 = vpop.f32.mrb[44].mxu1  ;;  %v1709_v44 = vmul.f32 %v2700_v8, %v3563_v12  ;;  %v2702_v53 = vpop.eup %2701 }
 0x228   : > { %v1657_v11 = vadd.f32 %v2553_v14, %v3551_v13  ;;  %1736 = vadd.xlane.f32.xlu1 %v1703_v33  ;;  %v1648_v30 = vpop.f32.mrb[45].mxu1  ;;  %v1707_v14 = vmul.f32 %v2702_v53, %v3563_v12 }
 0x229   : > { %v1649_v38 = vadd.f32 %v3551_v13, %v1648_v30  ;;  %v2554_v50 = vpop.f32.mrb[46].mxu1 }
 0x22a   : > { %v1651_v34 = vpop.f32.mrb[47].mxu1  ;;  %v1660_v22 = vadd.f32 %v2554_v50, %v3551_v13 }
 0x22b   : > { %2711 = vtanh.f32 %v1649_v38  ;;  %v1652_v2 = vadd.f32 %v3551_v13, %v1651_v34  ;;  %1742 = vadd.xlane.f32.xlu0 %v1706_v32 }
 0x22c   : > { %v2704_v37 = vpop.eup %2703  ;;  %2713 = vtanh.f32 %v1657_v11  ;;  %1748 = vadd.xlane.f32.xlu1 %v1709_v44 }
 0x22d   : > { %2715 = vtanh.f32 %v1652_v2  ;;  %v1712_v1 = vmul.f32 %v2704_v37, %v3563_v12  ;;  %v2706_v33 = vpop.eup %2705 }
 0x22e   : > { %v2708_v63 = vpop.eup %2707  ;;  %2717 = vtanh.f32 %v1660_v22  ;;  %v1710_v8 = vmul.f32 %v2706_v33, %v3563_v12 }
 0x22f   : > { %1754 = vadd.xlane.f32.xlu0 %v1712_v1  ;;  %v1713_v30 = vmul.f32 %v2708_v63, %v3563_v12  ;;  %v2710_v38 = vpop.eup %2709 }
 0x230   : > { %1744 = vadd.xlane.f32.xlu1 %v1707_v14  ;;  %v1711_v13 = vmul.f32 %v2710_v38, %v3563_v12 }
 0x233   : > { %1750 = vadd.xlane.f32.xlu0 %v1710_v8 }
 0x234   : > { %1756 = vadd.xlane.f32.xlu1 %v1713_v30 }
 0x235   : > { %v2712_v11 = vpop.eup %2711 }
 0x236   : > { %v2714_v32 = vpop.eup %2713  ;;  %v1714_v50 = vmul.f32 %v2712_v11, %v3563_v12 }
 0x237   : > { %v2716_v34 = vpop.eup %2715  ;;  %v1716_v53 = vmul.f32 %v2714_v32, %v3563_v12 }
 0x238   : > { %1752 = vadd.xlane.f32.xlu1 %v1711_v13  ;;  %1758 = vadd.xlane.f32.xlu0 %v1714_v50  ;;  %v1715_v44 = vmul.f32 %v2716_v34, %v3563_v12  ;;  %v2718_v2 = vpop.eup %2717  ;;  %v1766_v34 = vlaneseq }
 0x239   : > { %v1717_v37 = vmul.f32 %v2718_v2, %v3563_v12 }
 0x23a   : > { %v3606_v46 = vand.u32 127, %v1766_v34  ;;  %v3609_v2 = vshrl.u32 %v1766_v34, 7 }
 0x23c   : > { %1760 = vadd.xlane.f32.xlu1 %v1715_v44  ;;  %1762 = vadd.xlane.f32.xlu0 %v1716_v53  ;;  %v1797_v44 = vadd.s32 4294967288, %v3606_v46  ;;  %v3617_v52 = vsub.s32 %v3606_v46, %v3609_v2  ;;  %vm1768_vm0 = vcmp.lt.s32.totalorder %v3606_v46, 20 }
 0x23e   : > { %v3613_v15 = vsub.s32 %v1797_v44, %v3609_v2 }
 0x240   : > { %1764 = vadd.xlane.f32.xlu1 %v1717_v37  ;;  %v1804_v37 = vadd.s32 4294967280, %v3606_v46  ;;  %v1939_v46 = vsub.s32 0, %v3609_v2 }
 0x242   : > { %v3620_v36 = vsub.s32 %v1804_v37, %v3609_v2 }
 0x29c   : > { %v1723_v22 = vpop.xlane.xlu0 %1722 }
 0x29e   : > { %v1725_v33 = vpop.xlane.xlu1 %1724 }
 0x29f   : > { %v1814_v27 = vrot.slane %v1725_v33, %v3617_v52 }
 0x2a0   : > { %v1719_v1 = vpop.xlane.xlu0 %1718 }
 0x2a1   : > { %v1796_v4 = vrot.slane %v1719_v1, %v3617_v52 }
 0x2a4   : > { %v1721_v14 = vpop.xlane.xlu0 %1720 }
 0x2a5   : > { %v1727_v63 = vpop.xlane.xlu1 %1726  ;;  %v1801_v60 = vrot.slane %v1721_v14, %v3613_v15 }
 0x2a6   : > { %v1818_v34 = vrot.slane %v1727_v63, %v3613_v15 }
 0x2a8   : > { %v1731_v8 = vpop.xlane.xlu0 %1730  ;;  %v1819_v1 = vsel %vm1802_vm7, %v1818_v34, %v1814_v27 }
 0x2a9   : > { %v1733_v30 = vpop.xlane.xlu1 %1732  ;;  %v1828_v49 = vrot.slane %v1731_v8, %v3617_v52  ;;  %v1808_v8 = vrot.slane %v1723_v22, %v3620_v36 }
 0x2aa   : > { %v1832_v44 = vrot.slane %v1733_v30, %v3613_v15  ;;  %v1803_v30 = vsel %vm1802_vm7, %v1801_v60, %v1796_v4 }
 0x2ac   : > { %v1739_v38 = vpop.xlane.xlu0 %1738 }
 0x2ad   : > { %v1729_v11 = vpop.xlane.xlu1 %1728  ;;  %v1846_v14 = vrot.slane %v1739_v38, %v3613_v15 }
 0x2ae   : > { %v1823_v23 = vrot.slane %v1729_v11, %v3620_v36  ;;  %v1833_v11 = vsel %vm1802_vm7, %v1832_v44, %v1828_v49 }
 0x2b0   : > { %v1735_v13 = vpop.xlane.xlu0 %1734  ;;  %v1824_v51 = vsel %vm1809_vm8, %v1823_v23, %v1819_v1 }
 0x2b1   : > { %v1741_v50 = vpop.xlane.xlu1 %1740  ;;  %v1837_v63 = vrot.slane %v1735_v13, %v3620_v36 }
 0x2b2   : > { %v1851_v13 = vrot.slane %v1741_v50, %v3620_v36 }
 0x2b3   : > { %v1838_v60 = vsel %vm1809_vm8, %v1837_v63, %v1833_v11 }
 0x2b4   : > { %v1747_v18 = vpop.xlane.xlu0 %1746 }
 0x2b5   : > { %v1737_v32 = vpop.xlane.xlu1 %1736  ;;  %v1865_v27 = vrot.slane %v1747_v18, %v3620_v36 }
 0x2b6   : > { %v1842_v40 = vrot.slane %v1737_v32, %v3617_v52 }
 0x2b8   : > { %v1743_v12 = vpop.xlane.xlu0 %1742 }
 0x2b9   : > { %v1749_v53 = vpop.xlane.xlu1 %1748  ;;  %v1856_v32 = vrot.slane %v1743_v12, %v3617_v52 }
 0x2ba   : > { %v1870_v49 = vrot.slane %v1749_v53, %v3617_v52 }
 0x2bc   : > { %v1755_v45 = vpop.xlane.xlu0 %1754 }
 0x2bd   : > { %v1745_v21 = vpop.xlane.xlu1 %1744  ;;  %v1884_v53 = vrot.slane %v1755_v45, %v3617_v52 }
 0x2be   : > { %v1860_v37 = vrot.slane %v1745_v21, %v3613_v15  ;;  %v1847_v21 = vsel %vm1802_vm7, %v1846_v14, %v1842_v40  ;;  %v1810_v40 = vsel %vm1809_vm8, %v1808_v8, %v1803_v30 }
 0x2bf   : > { %v1910_v23 = vsel %vm1909_vm9, %v1824_v51, %v1810_v40 }
 0x2c0   : > { %v1751_v17 = vpop.xlane.xlu0 %1750  ;;  %v1861_v22 = vsel %vm1802_vm7, %v1860_v37, %v1856_v32  ;;  %v1912_v37 = vsel %vm1911_vm10, %v1838_v60, %v1910_v23  ;;  %v1954_v23 = vsub.s32 1, %v3609_v2 }
 0x2c1   : > { %v1757_v42 = vpop.xlane.xlu1 %1756  ;;  %v1874_v33 = vrot.slane %v1751_v17, %v3613_v15  ;;  %v1852_v17 = vsel %vm1809_vm8, %v1851_v13, %v1847_v21  ;;  %v1866_v50 = vsel %vm1809_vm8, %v1865_v27, %v1861_v22 }
 0x2c2   : > { %v1888_v12 = vrot.slane %v1757_v42, %v3613_v15  ;;  %v1914_v42 = vsel %vm1913_vm11, %v1852_v17, %v1912_v37  ;;  %v1999_v37 = vsub.s32 4, %v3609_v2 }
 0x2c3   : > { %v1916_v30 = vsel %vm1915_vm12, %v1866_v50, %v1914_v42  ;;  %v1969_v50 = vsub.s32 2, %v3609_v2 }
 0x2c4   : > { %v1889_v8 = vsel %vm1802_vm7, %v1888_v12, %v1884_v53 }
 0x2c5   : > { %v1753_v59 = vpop.xlane.xlu1 %1752  ;;  %v1759_v38 = vpop.xlane.xlu0 %1758 }
 0x2c6   : > { %v1879_v4 = vrot.slane %v1753_v59, %v3620_v36  ;;  %v1875_v59 = vsel %vm1802_vm7, %v1874_v33, %v1870_v49  ;;  %v1893_v34 = vrot.slane %v1759_v38, %v3620_v36 }
 0x2c8   : > { %v1880_v14 = vsel %vm1809_vm8, %v1879_v4, %v1875_v59  ;;  %v1894_v32 = vsel %vm1809_vm8, %v1893_v34, %v1889_v8  ;;  %v2044_v8 = vsub.s32 7, %v3609_v2 }
 0x2c9   : > { %v1761_v44 = vpop.xlane.xlu1 %1760  ;;  %v1763_v18 = vpop.xlane.xlu0 %1762  ;;  %v1918_v11 = vsel %vm1917_vm13, %v1880_v14, %v1916_v30  ;;  %v2014_v14 = vsub.s32 5, %v3609_v2 }
 0x2ca   : > { %v1898_v63 = vrot.slane %v1761_v44, %v3617_v52  ;;  %v1902_v51 = vrot.slane %v1763_v18, %v3613_v15  ;;  %v1920_v15 = vsel %vm1919_vm14, %v1894_v32, %v1918_v11  ;;  %v1984_v44 = vsub.s32 3, %v3609_v2 }
 0x2cc   : > { %v1903_v21 = vsel %vm1802_vm7, %v1902_v51, %v1898_v63  ;;  %v2029_v63 = vsub.s32 6, %v3609_v2 }
 0x2cd   : > { %v1765_v1 = vpop.xlane.xlu1 %1764 }
 0x2ce   : > { %v1907_v45 = vrot.slane %v1765_v1, %v3620_v36 }
 0x2d0   : > { %v1908_v52 = vsel %vm1809_vm8, %v1907_v45, %v1903_v21 }
 0x2d1   : > { %v1922_v33 = vsel %vm1921_vm15, %v1908_v52, %v1920_v15 }
 0x2d2   : > { %v1924_v38 = vsel %vm1768_vm0, %v1922_v33, -1e+30 }
 0x2d3   : > { %v1926_v13 = vsel %vm1925_vm1, %v1924_v38, -inf }
 0x2d4   : > { %1927 = vmax.xlane.f32.xlu0 %v1926_v13 }
 0x361   : > { %v1928_v22 = vpop.xlane.xlu0 %1927 }
 0x362   : > { %v1929_v4 = vsub.f32 %v1924_v38, %v1928_v22 }
 0x364   : > { %v1930_v60 = vmul.f32 1.442695, %v1929_v4 }
 0x366   : > { %2719 = vpow2.f32 %v1930_v60 }
 0x370   : > { %v2720_v36 = vpop.eup %2719 }
 0x371   : > { %v1932_v27 = vsel %vm1925_vm1, %v2720_v36, 0.0 }
 0x372   : > { %1933 = vadd.xlane.f32.xlu1 %v1932_v27 }
 0x3ff   : > { %v1934_v49 = vpop.xlane.xlu1 %1933 }
 0x400   : > { %2721 = vrcp.f32 %v1934_v49 }
 0x40a   : > { %v2722_v40 = vpop.eup %2721 }
 0x40b   : > { %v1936_v17 = vmul.f32 %v2722_v40, %v2720_v36  ;;  %v3818_v40 = vmax.f32 %v3434_v54, 0.0  ;;  %v3823_v54 = vmax.f32 %v3476_v61, 0.0 }
 0x40d   : > { %v1940_v12 = vrot.slane %v1936_v17, %v1939_v46  ;;  %v1955_v59 = vrot.slane %v1936_v17, %v1954_v23  ;;  %v1970_v34 = vrot.slane %v1936_v17, %v1969_v50  ;;  %v1985_v18 = vrot.slane %v1936_v17, %v1984_v44 }
 0x40e   : > { %v2000_v53 = vrot.slane %v1936_v17, %v1999_v37  ;;  %v2015_v42 = vrot.slane %v1936_v17, %v2014_v14  ;;  %v2030_v51 = vrot.slane %v1936_v17, %v2029_v63  ;;  %v2045_v30 = vrot.slane %v1936_v17, %v2044_v8 }
 0x40f   : > { %1946 = vbcast.lane.b32.xlu1 %v1940_v12, 264  ;;  %1942 = vbcast.lane.b32.xlu0 %v1940_v12, 256  ;;  %v3825_v37 = vmax.f32 %v3486_v57, 0.0  ;;  %v3826_v63 = vmax.f32 %v3458_v39, 0.0 }
 0x413   : > { %1957 = vbcast.lane.b32.xlu1 %v1955_v59, 256  ;;  %1972 = vbcast.lane.b32.xlu0 %v1970_v34, 256 }
 0x417   : > { %1961 = vbcast.lane.b32.xlu1 %v1955_v59, 264  ;;  %1950 = vbcast.lane.b32.xlu0 %v1940_v12, 272 }
 0x41b   : > { %1976 = vbcast.lane.b32.xlu1 %v1970_v34, 264  ;;  %1987 = vbcast.lane.b32.xlu0 %v1985_v18, 256 }
 0x41f   : > { %1965 = vbcast.lane.b32.xlu1 %v1955_v59, 272  ;;  %1980 = vbcast.lane.b32.xlu0 %v1970_v34, 272 }
 0x423   : > { %1991 = vbcast.lane.b32.xlu1 %v1985_v18, 264  ;;  %2006 = vbcast.lane.b32.xlu0 %v2000_v53, 264 }
 0x427   : > { %2002 = vbcast.lane.b32.xlu1 %v2000_v53, 256  ;;  %2017 = vbcast.lane.b32.xlu0 %v2015_v42, 256 }
 0x42b   : > { %1995 = vbcast.lane.b32.xlu1 %v1985_v18, 272  ;;  %2010 = vbcast.lane.b32.xlu0 %v2000_v53, 272 }
 0x42f   : > { %2021 = vbcast.lane.b32.xlu1 %v2015_v42, 264  ;;  %2036 = vbcast.lane.b32.xlu0 %v2030_v51, 264 }
 0x433   : > { %2032 = vbcast.lane.b32.xlu1 %v2030_v51, 256  ;;  %2047 = vbcast.lane.b32.xlu0 %v2045_v30, 256 }
 0x437   : > { %2025 = vbcast.lane.b32.xlu1 %v2015_v42, 272  ;;  %2040 = vbcast.lane.b32.xlu0 %v2030_v51, 272  ;;  %v3827_v51 = vmax.f32 %v3480_v48, 0.0 }
 0x43b   : > { %2051 = vbcast.lane.b32.xlu1 %v2045_v30, 264 }
 0x43f   : > { %2055 = vbcast.lane.b32.xlu1 %v2045_v30, 272 }
 0x481   : > { %v1947_v32 = vpop.permute.xlu1 %1946  ;;  %v1943_v1 = vpop.permute.xlu0 %1942 }
 0x482   : > { %v2058_v27 = vmul.f32 %v1947_v32, %v1428_v62  ;;  %v2057_v49 = vmul.f32 %v1943_v1, %v1427_v16 }
 0x484   : > { %v2081_v62 = vadd.f32 %v2058_v27, %v2057_v49  ;;  %v3830_v27 = vmax.f32 %v3483_v43, 0.0 }
 0x485   : > { %v1958_v11 = vpop.permute.xlu1 %1957  ;;  %v1973_v45 = vpop.permute.xlu0 %1972 }
 0x486   : > { %v2060_v22 = vmul.f32 %v1958_v11, %v1430_v41  ;;  %v2063_v41 = vmul.f32 %v1973_v45, %v3820_v55 }
 0x489   : > { %v1962_v21 = vpop.permute.xlu1 %1961  ;;  %v1951_v52 = vpop.permute.xlu0 %1950 }
 0x48a   : > { %v2061_v2 = vmul.f32 %v1962_v21, %v1431_v0  ;;  %v2059_v0 = vmul.f32 %v1951_v52, %v3819_v31 }
 0x48c   : > { %v2089_v46 = vadd.f32 %v2061_v2, %v2060_v22  ;;  %v2082_v34 = vadd.f32 %v2081_v62, %v2059_v0  ;;  %v3828_v22 = vmax.f32 %v3501_v28, 0.0  ;;  %v3832_v28 = vmax.f32 %v3510_v25, 0.0 }
 0x48d   : > { %v1977_v15 = vpop.permute.xlu1 %1976  ;;  %v1988_v33 = vpop.permute.xlu0 %1987  ;;  %v3835_v25 = vmax.f32 %v3534_v9, 0.0 }
 0x48e   : > { %v2064_v17 = vmul.f32 %v1977_v15, %v3818_v40  ;;  %v2066_v44 = vmul.f32 %v1988_v33, %v3824_v26  ;;  %v2083_v30 = vrot.slane %v2082_v34, 4 }
 0x490   : > { %v2097_v50 = vadd.f32 %v2064_v17, %v2063_v41  ;;  %v2084_v57 = vadd.f32 %v2083_v30, %v2082_v34  ;;  %v3836_v30 = vmax.f32 %v3531_v29, 0.0 }
 0x491   : > { %v1966_v38 = vpop.permute.xlu1 %1965  ;;  %v1981_v13 = vpop.permute.xlu0 %1980 }
 0x492   : > { %v2062_v4 = vmul.f32 %v1966_v38, %v1432_v20  ;;  %v3821_v20 = vmax.f32 %v3452_v24, 0.0 }
 0x494   : > { %v2090_v10 = vadd.f32 %v2089_v46, %v2062_v4  ;;  %v2065_v12 = vmul.f32 %v1981_v13, %v3821_v20  ;;  %v3829_v4 = vmax.f32 %v3504_v3, 0.0  ;;  %v3831_v46 = vmax.f32 %v3507_v56, 0.0 }
 0x495   : > { %v1992_v60 = vpop.permute.xlu1 %1991  ;;  %v2007_v36 = vpop.permute.xlu0 %2006  ;;  %v3833_v3 = vmax.f32 %v3525_v35, 0.0 }
 0x496   : > { %v2067_v16 = vmul.f32 %v1992_v60, %v3822_v47  ;;  %v2091_v7 = vrot.slane %v2090_v10, 4  ;;  %v2098_v18 = vadd.f32 %v2097_v50, %v2065_v12  ;;  %v2070_v24 = vmul.f32 %v2007_v36, %v3825_v37 }
 0x497   : > { %v2085_v36 = vrot.slane %v2084_v57, 2 }
 0x498   : > { %v2105_v42 = vadd.f32 %v2067_v16, %v2066_v44  ;;  %v2092_v1 = vadd.f32 %v2091_v7, %v2090_v10  ;;  %v2099_v19 = vrot.slane %v2098_v18, 4  ;;  %v3834_v44 = vmax.f32 %v3528_v6, 0.0 }
 0x499   : > { %v2003_v23 = vpop.permute.xlu1 %2002  ;;  %v2018_v58 = vpop.permute.xlu0 %2017  ;;  %v2086_v47 = vadd.f32 %v2085_v36, %v2084_v57 }
 0x49a   : > { %v2069_v59 = vmul.f32 %v2003_v23, %v3823_v54  ;;  %v2093_v15 = vrot.slane %v2092_v1, 2  ;;  %v2100_v33 = vadd.f32 %v2099_v19, %v2098_v18  ;;  %v2072_v49 = vmul.f32 %v2018_v58, %v3830_v27 }
 0x49b   : > { %v2087_v18 = vrot.slane %v2086_v47, 1 }
 0x49c   : > { %v2113_v61 = vadd.f32 %v2070_v24, %v2069_v59  ;;  %v2094_v17 = vadd.f32 %v2093_v15, %v2092_v1  ;;  %v2101_v31 = vrot.slane %v2100_v33, 2 }
 0x49d   : > { %v1996_v53 = vpop.permute.xlu1 %1995  ;;  %v2011_v14 = vpop.permute.xlu0 %2010  ;;  %v2088_v6 = vadd.f32 %v2087_v18, %v2086_v47 }
 0x49e   : > { %v2068_v5 = vmul.f32 %v1996_v53, %v3826_v63  ;;  %v2071_v8 = vmul.f32 %v2011_v14, %v3827_v51  ;;  %v2095_v16 = vrot.slane %v2094_v17, 1  ;;  %v2102_v56 = vadd.f32 %v2101_v31, %v2100_v33 }
 0x4a0   : > { %v2106_v32 = vadd.f32 %v2105_v42, %v2068_v5  ;;  %v2114_v11 = vadd.f32 %v2113_v61, %v2071_v8  ;;  %v2096_v53 = vadd.f32 %v2095_v16, %v2094_v17  ;;  %v2103_v14 = vrot.slane %v2102_v56, 1 }
 0x4a1   : > { %v2022_v45 = vpop.permute.xlu1 %2021  ;;  %v2037_v21 = vpop.permute.xlu0 %2036 }
 0x4a2   : > { %v2107_v52 = vrot.slane %v2106_v32, 4  ;;  %v2115_v13 = vrot.slane %v2114_v11, 4  ;;  %v2073_v48 = vmul.f32 %v2022_v45, %v3828_v22  ;;  %v2076_v40 = vmul.f32 %v2037_v21, %v3831_v46 }
 0x4a3   : > { %v2153_v21 = vsel %vm1909_vm9, %v2096_v53, %v2088_v6 }
 0x4a4   : > { %v2108_v38 = vadd.f32 %v2107_v52, %v2106_v32  ;;  %v2116_v55 = vadd.f32 %v2115_v13, %v2114_v11  ;;  %v2121_v20 = vadd.f32 %v2073_v48, %v2072_v49  ;;  %v2104_v11 = vadd.f32 %v2103_v14, %v2102_v56 }
 0x4a5   : > { %v2033_v2 = vpop.permute.xlu1 %2032  ;;  %v2048_v39 = vpop.permute.xlu0 %2047 }
 0x4a6   : > { %v2075_v60 = vmul.f32 %v2033_v2, %v3829_v4  ;;  %v2109_v0 = vrot.slane %v2108_v38, 2  ;;  %v2117_v54 = vrot.slane %v2116_v55, 2  ;;  %v2078_v37 = vmul.f32 %v2048_v39, %v3835_v25 }
 0x4a8   : > { %v2129_v12 = vadd.f32 %v2076_v40, %v2075_v60  ;;  %v2110_v50 = vadd.f32 %v2109_v0, %v2108_v38  ;;  %v2118_v63 = vadd.f32 %v2117_v54, %v2116_v55  ;;  %v2154_v38 = vsel %vm1911_vm10, %v2104_v11, %v2153_v21 }
 0x4a9   : > { %v2026_v41 = vpop.permute.xlu1 %2025  ;;  %v2041_v10 = vpop.permute.xlu0 %2040 }
 0x4aa   : > { %v2074_v23 = vmul.f32 %v2026_v41, %v3832_v28  ;;  %v2077_v62 = vmul.f32 %v2041_v10, %v3833_v3  ;;  %v2111_v42 = vrot.slane %v2110_v50, 1  ;;  %v2119_v9 = vrot.slane %v2118_v63, 1 }
 0x4ac   : > { %v2122_v43 = vadd.f32 %v2121_v20, %v2074_v23  ;;  %v2130_v58 = vadd.f32 %v2129_v12, %v2077_v62  ;;  %v2112_v52 = vadd.f32 %v2111_v42, %v2110_v50  ;;  %v2120_v13 = vadd.f32 %v2119_v9, %v2118_v63 }
 0x4ad   : > { %v2052_v59 = vpop.permute.xlu1 %2051 }
 0x4ae   : > { %v2123_v34 = vrot.slane %v2122_v43, 4  ;;  %v2131_v26 = vrot.slane %v2130_v58, 4  ;;  %v2079_v7 = vmul.f32 %v2052_v59, %v3834_v44  ;;  %v2155_v2 = vsel %vm1913_vm11, %v2112_v52, %v2154_v38 }
 0x4af   : > { %v2156_v60 = vsel %vm1915_vm12, %v2120_v13, %v2155_v2 }
 0x4b0   : > { %v2124_v24 = vadd.f32 %v2123_v34, %v2122_v43  ;;  %v2132_v35 = vadd.f32 %v2131_v26, %v2130_v58  ;;  %v2137_v61 = vadd.f32 %v2079_v7, %v2078_v37 }
 0x4b1   : > { %v2056_v5 = vpop.permute.xlu1 %2055 }
 0x4b2   : > { %v2125_v51 = vrot.slane %v2124_v24, 2  ;;  %v2133_v8 = vrot.slane %v2132_v35, 2  ;;  %v2080_v32 = vmul.f32 %v2056_v5, %v3836_v30 }
 0x4b4   : > { %v2126_v1 = vadd.f32 %v2125_v51, %v2124_v24  ;;  %v2138_v19 = vadd.f32 %v2137_v61, %v2080_v32  ;;  %v2134_v45 = vadd.f32 %v2133_v8, %v2132_v35 }
 0x4b6   : > { %v2127_v57 = vrot.slane %v2126_v1, 1  ;;  %v2139_v15 = vrot.slane %v2138_v19, 4  ;;  %v2135_v29 = vrot.slane %v2134_v45, 1 }
 0x4b8   : > { %v2140_v33 = vadd.f32 %v2139_v15, %v2138_v19  ;;  %v2128_v39 = vadd.f32 %v2127_v57, %v2126_v1  ;;  %v2136_v4 = vadd.f32 %v2135_v29, %v2134_v45 }
 0x4ba   : > { %v2141_v22 = vrot.slane %v2140_v33, 2  ;;  %v2157_v27 = vsel %vm1917_vm13, %v2128_v39, %v2156_v60 }
 0x4bb   : > { %v2158_v46 = vsel %vm1919_vm14, %v2136_v4, %v2157_v27 }
 0x4bc   : > { %v2142_v48 = vadd.f32 %v2141_v22, %v2140_v33 }
 0x4be   : > { %v2143_v36 = vrot.slane %v2142_v48, 1 }
 0x4c0   : > { %v2144_v49 = vadd.f32 %v2143_v36, %v2142_v48 }
 0x4c2   : > { %v2159_v40 = vsel %vm1921_vm15, %v2144_v49, %v2158_v46 }
 0x4c3   : > { %2161 = vst [vmem:[%s247_s13] sm:$0xff] %v2159_v40 }
 0x4c4   : > { %2736 = shalt.err (!%p2733_p3)
}
 0x4c5   : > { %s2737_s28 = scalar_lea.hbm %s3737_s16, 128  ;;  %s2741_s10 = scalar_lea.hbm %s3786_s6, 256 }
 0x4c6   : > { %p2738_p4 = scmp.ne.s32.totalorder %s3737_s16, %s2737_s28  ;;  %p2742_p9 = scmp.lt.u32.totalorder %s3737_s16, %s3786_s6 }
 0x4c7   : > { %p2743_p10 = scmp.lt.u32.totalorder %s2741_s10, %s2737_s28  ;;  %p2745_p12 = scmp.lt.u32.totalorder %s2737_s28, %s3737_s16 }
 0x4c8   : > { %p2739_p7 = pnand %p2738_p4, %p2861_p5 }
 0x4c9   : > { %p2744_p11 = por %p2743_p10, %p2742_p9 }
 0x4ca   : > { %p2740_p8 = pneg %p2739_p7 }
 0x4cb   : > { %p2746_p13 = por %p2745_p12, %p2744_p11 }
 0x4cd   : > { %p2747_p0 = pnand %p2746_p13, %p2740_p8 }
 0x4cf   : > { %2750 = shalt.err (!%p2747_p0)
}
 0x4d0   : > { %2603 = dma.vmem_to_hbm [thread:$0]  (%p2861_p5), %s3739_s14, 128, %s3737_s16, %s2163_s17  }
 0x4d1 PF: > { %p2609_p1 = scmp.ge.s32.totalorder %s2785_s24, 2  ;;  %s2188_s13 = sand.u32 1, %s2773_s21  }
 0x4d2   : > { %s2189_s19 = scalar_lea.sflag [#allocation3], %s2188_s13 }
 0x4d3   : > { %p2606_p2 = pnand %p2609_p1, %p2865_p6 }
 0x4d5   : > { %2768 = dma.done.wait (!%p2606_p2), %s2189_s19, 128  }
 0x4d6   : > { %2770 = vsyncadd (!%p2606_p2), %s2189_s19, 4294967168  ;;  %p16_p3 = scmp.ge.s32.totalorder %s2848_s27, 4   ;;  %s3837_s21 = smov %s2777_s22 }
 0x4d7   : > { %s3838_s22 = smov %s2781_s23  ;;  %s3839_s23 = smov %s2859_s30 }
 0x4d8   : > { %s3840_s24 = smov %s2848_s27  ;;  %18 = sbr.rel (!%p16_p3) target bundleno = 3 (0x3), region = 81 }
 0x4df   :  { %2194 = vsyncpa [#allocation3], 1 }
 0x4e0   :  { %2196 = vsyncpa [#allocation3 + $0x1], 1 }

</bundles_post_ra>
